<compile_context>
chip_gen: v5e
topology: v5e:2x2
jax: 0.10.0
libtpu: 0.0.40
codegen_flags: <defaults>
</compile_context>

<pallas_src>
import math

import jax
import jax.numpy as jnp
import numpy as np
from jax.experimental import pallas as pl
from jax.experimental.pallas import tpu as pltpu

NUM_GROUPS = 32
GN_EPS = 1e-5


# ----------------------------- Pallas kernel -------------------------------
def attention_block_kernel(
    gn_scale_ref,   # (1, 1, C)  per-channel GroupNorm scale  (f32)
    gn_shift_ref,   # (1, 1, C)  per-channel GroupNorm shift  (f32)
    xq_ref,         # (1, TQ, C) input tile for queries + residual (f32)
    xkv_ref,        # (1, TK, C) input tile for keys/values        (f32)
    wq_ref,         # (C, C)  fused qkv-conv + in_proj (query), scale folded in (bf16)
    wk_ref,         # (C, C)  fused (key)   (bf16)
    wv_ref,         # (C, C)  fused (value) (bf16)
    wo_ref,         # (C, C)  fused out_proj + out-conv (bf16)
    bq_ref,         # (1, C)  fused bias (scaled)  (f32)
    bk_ref,         # (1, C)
    bv_ref,         # (1, C)
    bo_ref,         # (1, C)
    o_ref,          # (1, TQ, C) output tile (f32)
    q_sc,           # (TQ, C) bf16 scratch: projected queries for this q-tile
    m_sc,           # (TQ, 1) f32 scratch: running max
    l_sc,           # (TQ, 1) f32 scratch: running sum
    acc_sc,         # (TQ, C) f32 scratch: output accumulator
):
    ki = pl.program_id(2)
    gn_s = gn_scale_ref[0]          # (1, C) f32
    gn_b = gn_shift_ref[0]          # (1, C) f32

    # ---- init for this (batch, q-tile): project queries once, reset softmax state ----
    @pl.when(ki == 0)
    def _():
        xq = xq_ref[0]                                              # (TQ, C) f32
        xqn = (xq * gn_s + gn_b).astype(jnp.bfloat16)               # GroupNorm as scale/shift
        q = jnp.dot(xqn, wq_ref[...],
                    preferred_element_type=jnp.float32) + bq_ref[...]
        q_sc[...] = q.astype(jnp.bfloat16)                          # 1/sqrt(C) already folded in
        m_sc[...] = jnp.full(m_sc.shape, -jnp.inf, dtype=jnp.float32)
        l_sc[...] = jnp.zeros(l_sc.shape, dtype=jnp.float32)
        acc_sc[...] = jnp.zeros(acc_sc.shape, dtype=jnp.float32)

    # ---- project this KV tile (fused conv+in_proj) ----
    xkv = xkv_ref[0]                                                # (TK, C) f32
    xkvn = (xkv * gn_s + gn_b).astype(jnp.bfloat16)
    k = (jnp.dot(xkvn, wk_ref[...], preferred_element_type=jnp.float32)
         + bk_ref[...]).astype(jnp.bfloat16)                        # (TK, C)
    v = (jnp.dot(xkvn, wv_ref[...], preferred_element_type=jnp.float32)
         + bv_ref[...]).astype(jnp.bfloat16)                        # (TK, C)

    # ---- online softmax (flash) step ----
    s = jax.lax.dot_general(q_sc[...], k, (((1,), (1,)), ((), ())),
                            preferred_element_type=jnp.float32)     # (TQ, TK) = q @ k^T
    m_prev = m_sc[...]
    m_new = jnp.maximum(m_prev, jnp.max(s, axis=-1, keepdims=True))
    alpha = jnp.exp(m_prev - m_new)                                 # (TQ, 1)
    p = jnp.exp(s - m_new)                                          # (TQ, TK) f32
    l_sc[...] = alpha * l_sc[...] + jnp.sum(p, axis=-1, keepdims=True)
    acc_sc[...] = alpha * acc_sc[...] + jnp.dot(
        p.astype(jnp.bfloat16), v, preferred_element_type=jnp.float32)
    m_sc[...] = m_new

    # ---- finalize: normalize once, fused out_proj + out-conv, residual add ----
    @pl.when(ki == pl.num_programs(2) - 1)
    def _():
        out = acc_sc[...] * pl.reciprocal(l_sc[...], approx=True)   # (TQ, C) f32
        y = jnp.dot(out.astype(jnp.bfloat16), wo_ref[...],
                    preferred_element_type=jnp.float32) + bo_ref[...]
        o_ref[0] = (y + xq_ref[0]).astype(o_ref.dtype)              # residual = original input


# ------------------------------- wrapper ------------------------------------
def _pick_tile(n, target):
    """Largest divisor of n that is <= target and a multiple of 8 (or n itself)."""
    if n <= target:
        return n
    for t in range(target, 7, -1):
        if n % t == 0 and t % 8 == 0:
            return t
    return n


def attention_block_forward(x_nchw, params):
    B, C, H, W = x_nchw.shape
    L = H * W
    assert C % NUM_GROUPS == 0
    f32 = jnp.float32
    bf16 = jnp.bfloat16

    x_f32 = x_nchw.astype(f32)
    # NCHW -> (B, L, C): channels on the lane axis for the projection GEMMs.
    x_blc = jnp.transpose(x_f32.reshape(B, C, L), (0, 2, 1))

    # ---- GroupNorm collapsed to per-(batch, channel) scale/shift ----
    # TODO(synk): the group mean/var is a tiny global reduction over L that conflicts with
    # the flash L-tiling; it is computed here (one cheap XLA reduction) instead of in-kernel.
    G = C // NUM_GROUPS
    gamma = params["gn_w"].astype(f32)
    beta = params["gn_b"].astype(f32)
    xg = x_f32.reshape(B, NUM_GROUPS, G * L)
    mean = jnp.mean(xg, axis=-1)                                  # (B, 32)
    var = jnp.var(xg, axis=-1)                                    # biased, matches GroupNorm
    inv = jax.lax.rsqrt(var + GN_EPS)
    mean_c = jnp.repeat(mean, G, axis=1)                          # (B, C)
    inv_c = jnp.repeat(inv, G, axis=1)                            # (B, C)
    gn_scale = (inv_c * gamma[None, :]).reshape(B, 1, C)
    gn_shift = (beta[None, :] - mean_c * inv_c * gamma[None, :]).reshape(B, 1, C)

    # ---- offline fusion: qkv 1x1-conv + MHA in_proj (scale folded into Q branch) ----
    qkv_w = params["qkv_w"][:, :, 0].astype(f32)                  # (3C, C)
    qkv_b = params["qkv_b"].astype(f32)                           # (3C,)
    in_w = params["in_w"].astype(f32)                             # (3C, C)
    in_b = params["in_b"].astype(f32)                             # (3C,)
    scale = 1.0 / math.sqrt(C)                                    # single head -> head_dim == C

    def fuse_proj(sl, s=1.0):
        w = (qkv_w[sl].T @ in_w[sl].T) * s                        # (C, C)
        b = (qkv_b[sl] @ in_w[sl].T + in_b[sl]) * s               # (C,)
        return w.astype(bf16), b.reshape(1, C).astype(f32)

    wq_f, bq_f = fuse_proj(slice(0, C), scale)
    wk_f, bk_f = fuse_proj(slice(C, 2 * C))
    wv_f, bv_f = fuse_proj(slice(2 * C, 3 * C))

    # ---- offline fusion: MHA out_proj + output 1x1-conv ----
    out_proj_w = params["out_proj_w"].astype(f32)                 # (C, C)
    out_proj_b = params["out_proj_b"].astype(f32)                 # (C,)
    out_w = params["out_w"][:, :, 0].astype(f32)                  # (C, C)
    out_b = params["out_b"].astype(f32)                           # (C,)
    wo_f = (out_proj_w.T @ out_w.T).astype(bf16)                  # (C, C)
    bo_f = (out_proj_b @ out_w.T + out_b).reshape(1, C).astype(f32)

    # ---- tiling: query tiles x kv tiles (flash), batch & q-tiles parallel ----
    TQ = _pick_tile(L, 256)
    TK = _pick_tile(L, 512)
    NQ, NK = L // TQ, L // TK
    grid = (B, NQ, NK)

    const_spec = lambda shape: pl.BlockSpec(shape, lambda b, qi, ki: (0,) * len(shape))
    per_batch = pl.BlockSpec((1, 1, C), lambda b, qi, ki: (b, 0, 0))
    in_specs = [
        per_batch,                                                 # gn_scale
        per_batch,                                                 # gn_shift
        pl.BlockSpec((1, TQ, C), lambda b, qi, ki: (b, qi, 0)),    # x (query / residual) tile
        pl.BlockSpec((1, TK, C), lambda b, qi, ki: (b, ki, 0)),    # x (key / value) tile
        const_spec((C, C)), const_spec((C, C)),                    # wq_f, wk_f
        const_spec((C, C)), const_spec((C, C)),                    # wv_f, wo_f
        const_spec((1, C)), const_spec((1, C)),                    # bq_f, bk_f
        const_spec((1, C)), const_spec((1, C)),                    # bv_f, bo_f
    ]
    out_spec = pl.BlockSpec((1, TQ, C), lambda b, qi, ki: (b, qi, 0))

    out_blc = pl.pallas_call(
        attention_block_kernel,
        out_shape=jax.ShapeDtypeStruct((B, L, C), f32),
        grid=grid,
        in_specs=in_specs,
        out_specs=out_spec,
        scratch_shapes=[
            pltpu.VMEM((TQ, C), bf16),     # projected queries
            pltpu.VMEM((TQ, 1), f32),      # running max
            pltpu.VMEM((TQ, 1), f32),      # running sum
            pltpu.VMEM((TQ, C), f32),      # output accumulator
        ],
        compiler_params=pltpu.CompilerParams(
            dimension_semantics=("parallel", "parallel", "arbitrary")),
    )(gn_scale, gn_shift, x_blc, x_blc,
      wq_f, wk_f, wv_f, wo_f, bq_f, bk_f, bv_f, bo_f)

    # (B, L, C) -> NCHW
    return jnp.transpose(out_blc, (0, 2, 1)).reshape(B, C, H, W)


# -------------------------- pure-JAX reference -------------------------------
def attention_block_reference(x_nchw, params):
    b, c, h, w = x_nchw.shape
    xin = x_nchw.reshape(b, c, h * w)                              # (B, C, L)
    # GroupNorm(32, c)
    xg = xin.reshape(b, NUM_GROUPS, (c // NUM_GROUPS) * h * w)
    mean = xg.mean(axis=-1, keepdims=True)
    var = ((xg - mean) ** 2).mean(axis=-1, keepdims=True)
    xn = ((xg - mean) / jnp.sqrt(var + GN_EPS)).reshape(b, c, h * w)
    xn = xn * params["gn_w"][None, :, None] + params["gn_b"][None, :, None]
    # qkv conv1d
    qkv = jnp.einsum("oc,bcl->bol", params["qkv_w"][:, :, 0], xn) + params["qkv_b"][None, :, None]
    qkv = qkv.transpose(0, 2, 1)                                   # (B, L, 3C)
    q, k, v = jnp.split(qkv, 3, axis=2)
    # MHA (1 head)
    Wq, Wk, Wv = jnp.split(params["in_w"], 3, axis=0)
    bq, bk, bv = jnp.split(params["in_b"], 3, axis=0)
    q = q @ Wq.T + bq
    k = k @ Wk.T + bk
    v = v @ Wv.T + bv
    s = jnp.einsum("bqd,bkd->bqk", q, k) / math.sqrt(c)
    p = jax.nn.softmax(s, axis=-1)
    a = jnp.einsum("bqk,bkd->bqd", p, v)
    a = a @ params["out_proj_w"].T + params["out_proj_b"]
    a = a.transpose(0, 2, 1)                                       # (B, C, L)
    y = jnp.einsum("oc,bcl->bol", params["out_w"][:, :, 0], a) + params["out_b"][None, :, None]
    y = y + xin
    return y.reshape(b, c, h, w)


# --------------------------------- main --------------------------------------
def make_params(key, C):
    ks = jax.random.split(key, 10)
    u = lambda k, shape, scale: jax.random.uniform(k, shape, jnp.float32, -scale, scale)
    return {
        "gn_w": jnp.ones((C,), jnp.float32),
        "gn_b": jnp.zeros((C,), jnp.float32),
        "qkv_w": u(ks[0], (3 * C, C, 1), 1.0 / math.sqrt(C)),
        "qkv_b": u(ks[1], (3 * C,), 1.0 / math.sqrt(C)),
        "in_w": u(ks[2], (3 * C, C), 1.0 / math.sqrt(C)),
        "in_b": u(ks[3], (3 * C,), 1.0 / math.sqrt(C)),
        "out_proj_w": u(ks[4], (C, C), 1.0 / math.sqrt(C)),
        "out_proj_b": u(ks[5], (C,), 1.0 / math.sqrt(C)),
        "out_w": u(ks[6], (C, C, 1), 1.0 / math.sqrt(C)),
        "out_b": u(ks[7], (C,), 1.0 / math.sqrt(C)),
    }


if __name__ == "__main__":
    key = jax.random.PRNGKey(0)
    k_x, k_p = jax.random.split(key)

    B, C, H, W = 2, 32, 8, 8        # in_channels must be divisible by 32 (GroupNorm(32, C))
    x = jax.random.normal(k_x, (B, C, H, W), jnp.float32)
    params = make_params(k_p, C)

    fwd = jax.jit(attention_block_forward)
    out = jax.block_until_ready(fwd(x, params))

    ref = jax.block_until_ready(attention_block_reference(x, params))
    # bf16 MXU operands (f32 accumulation) -> relaxed tolerance vs the all-f32 reference.
    np.testing.assert_allclose(np.asarray(out), np.asarray(ref), rtol=1e-2, atol=1e-2)

    print("KERNEL_OK")
</pallas_src>

<mosaic_0001>
module attributes {stable_mosaic.version = 11 : i64} {
  func.func @attention_block_kernel(%arg0: i32, %arg1: i32, %arg2: i32, %arg3: memref<1x1x32xf32, #tpu.memory_space<vmem>>, %arg4: memref<1x1x32xf32, #tpu.memory_space<vmem>>, %arg5: memref<1x64x32xf32, #tpu.memory_space<vmem>>, %arg6: memref<1x64x32xf32, #tpu.memory_space<vmem>>, %arg7: memref<32x32xbf16, #tpu.memory_space<vmem>>, %arg8: memref<32x32xbf16, #tpu.memory_space<vmem>>, %arg9: memref<32x32xbf16, #tpu.memory_space<vmem>>, %arg10: memref<32x32xbf16, #tpu.memory_space<vmem>>, %arg11: memref<1x32xf32, #tpu.memory_space<vmem>>, %arg12: memref<1x32xf32, #tpu.memory_space<vmem>>, %arg13: memref<1x32xf32, #tpu.memory_space<vmem>>, %arg14: memref<1x32xf32, #tpu.memory_space<vmem>>, %arg15: memref<1x64x32xf32, #tpu.memory_space<vmem>>, %arg16: memref<64x32xbf16, #tpu.memory_space<vmem>>, %arg17: memref<64x1xf32, #tpu.memory_space<vmem>>, %arg18: memref<64x1xf32, #tpu.memory_space<vmem>>, %arg19: memref<64x32xf32, #tpu.memory_space<vmem>>) attributes {dimension_semantics = [#tpu.dimension_semantics<parallel>, #tpu.dimension_semantics<parallel>, #tpu.dimension_semantics<arbitrary>], iteration_bounds = array<i64: 2, 1, 1>, scalar_prefetch = 0 : i64, scratch_operands = 4 : i64, tpu.core_type = #tpu.core_type<tc>, window_params = [{transform_indices = @transform_0, window_bounds = array<i64: 1, 1, 32>}, {transform_indices = @transform_1, window_bounds = array<i64: 1, 1, 32>}, {transform_indices = @transform_2, window_bounds = array<i64: 1, 64, 32>}, {transform_indices = @transform_3, window_bounds = array<i64: 1, 64, 32>}, {pipeline_mode = #tpu.pipeline_mode<synchronous>, transform_indices = @transform_4, window_bounds = array<i64: 32, 32>}, {pipeline_mode = #tpu.pipeline_mode<synchronous>, transform_indices = @transform_5, window_bounds = array<i64: 32, 32>}, {pipeline_mode = #tpu.pipeline_mode<synchronous>, transform_indices = @transform_6, window_bounds = array<i64: 32, 32>}, {pipeline_mode = #tpu.pipeline_mode<synchronous>, transform_indices = @transform_7, window_bounds = array<i64: 32, 32>}, {pipeline_mode = #tpu.pipeline_mode<synchronous>, transform_indices = @transform_8, window_bounds = array<i64: 1, 32>}, {pipeline_mode = #tpu.pipeline_mode<synchronous>, transform_indices = @transform_9, window_bounds = array<i64: 1, 32>}, {pipeline_mode = #tpu.pipeline_mode<synchronous>, transform_indices = @transform_10, window_bounds = array<i64: 1, 32>}, {pipeline_mode = #tpu.pipeline_mode<synchronous>, transform_indices = @transform_11, window_bounds = array<i64: 1, 32>}, {transform_indices = @transform_12, window_bounds = array<i64: 1, 64, 32>}]} {
    %c0 = arith.constant 0 : index
    %c0_0 = arith.constant 0 : index
    %c0_1 = arith.constant 0 : index
    %0 = vector.load %arg3[%c0, %c0_0, %c0_1] : memref<1x1x32xf32, #tpu.memory_space<vmem>>, vector<1x1x32xf32>
    %1 = vector.shape_cast %0 : vector<1x1x32xf32> to vector<1x32xf32>
    %c0_2 = arith.constant 0 : index
    %c0_3 = arith.constant 0 : index
    %c0_4 = arith.constant 0 : index
    %2 = vector.load %arg4[%c0_2, %c0_3, %c0_4] : memref<1x1x32xf32, #tpu.memory_space<vmem>>, vector<1x1x32xf32>
    %3 = vector.shape_cast %2 : vector<1x1x32xf32> to vector<1x32xf32>
    %c0_i32 = arith.constant 0 : i32
    %4 = arith.cmpi eq, %arg2, %c0_i32 : i32
    %5 = arith.extui %4 : i1 to i32
    %c0_i32_5 = arith.constant 0 : i32
    %6 = arith.cmpi ne, %5, %c0_i32_5 : i32
    scf.if %6 {
      %c0_38 = arith.constant 0 : index
      %c0_39 = arith.constant 0 : index
      %c0_40 = arith.constant 0 : index
      %54 = vector.load %arg5[%c0_38, %c0_39, %c0_40] : memref<1x64x32xf32, #tpu.memory_space<vmem>>, vector<1x64x32xf32>
      %55 = vector.shape_cast %54 : vector<1x64x32xf32> to vector<64x32xf32>
      %56 = vector.broadcast %1 : vector<1x32xf32> to vector<64x32xf32>
      %57 = arith.mulf %55, %56 : vector<64x32xf32>
      %58 = vector.broadcast %3 : vector<1x32xf32> to vector<64x32xf32>
      %59 = arith.addf %57, %58 : vector<64x32xf32>
      %60 = arith.truncf %59 : vector<64x32xf32> to vector<64x32xbf16>
      %c0_41 = arith.constant 0 : index
      %c0_42 = arith.constant 0 : index
      %61 = vector.load %arg7[%c0_41, %c0_42] : memref<32x32xbf16, #tpu.memory_space<vmem>>, vector<32x32xbf16>
      %cst_43 = arith.constant dense<0.000000e+00> : vector<64x32xf32>
      %62 = tpu.matmul %60, %61, %cst_43 {dimension_numbers = #tpu.dot_dimension_numbers<[1], [0], [0], [1], [0, 0, 1, 1], [], []>} : vector<64x32xbf16>, vector<32x32xbf16>, vector<64x32xf32> -> vector<64x32xf32>
      %c0_44 = arith.constant 0 : index
      %c0_45 = arith.constant 0 : index
      %63 = vector.load %arg11[%c0_44, %c0_45] : memref<1x32xf32, #tpu.memory_space<vmem>>, vector<1x32xf32>
      %64 = vector.broadcast %63 : vector<1x32xf32> to vector<64x32xf32>
      %65 = arith.addf %62, %64 : vector<64x32xf32>
      %66 = arith.truncf %65 : vector<64x32xf32> to vector<64x32xbf16>
      %c0_46 = arith.constant 0 : index
      %c0_47 = arith.constant 0 : index
      %67 = vector.load %arg16[%c0_46, %c0_47] : memref<64x32xbf16, #tpu.memory_space<vmem>>, vector<64x32xbf16>
      tpu.vector_store %arg16[%c0_46, %c0_47], %66 {strides = array<i32>} : memref<64x32xbf16, #tpu.memory_space<vmem>>, vector<64x32xbf16>,
      %cst_48 = arith.constant 0xFF800000 : f32
      %68 = vector.broadcast %cst_48 : f32 to vector<64x1xf32>
      %c0_49 = arith.constant 0 : index
      %c0_50 = arith.constant 0 : index
      %69 = vector.load %arg17[%c0_49, %c0_50] : memref<64x1xf32, #tpu.memory_space<vmem>>, vector<64x1xf32>
      tpu.vector_store %arg17[%c0_49, %c0_50], %68 {strides = array<i32>} : memref<64x1xf32, #tpu.memory_space<vmem>>, vector<64x1xf32>,
      %cst_51 = arith.constant 0.000000e+00 : f32
      %70 = vector.broadcast %cst_51 : f32 to vector<64x1xf32>
      %c0_52 = arith.constant 0 : index
      %c0_53 = arith.constant 0 : index
      %71 = vector.load %arg18[%c0_52, %c0_53] : memref<64x1xf32, #tpu.memory_space<vmem>>, vector<64x1xf32>
      tpu.vector_store %arg18[%c0_52, %c0_53], %70 {strides = array<i32>} : memref<64x1xf32, #tpu.memory_space<vmem>>, vector<64x1xf32>,
      %cst_54 = arith.constant 0.000000e+00 : f32
      %72 = vector.broadcast %cst_54 : f32 to vector<64x32xf32>
      %c0_55 = arith.constant 0 : index
      %c0_56 = arith.constant 0 : index
      %73 = vector.load %arg19[%c0_55, %c0_56] : memref<64x32xf32, #tpu.memory_space<vmem>>, vector<64x32xf32>
      tpu.vector_store %arg19[%c0_55, %c0_56], %72 {strides = array<i32>} : memref<64x32xf32, #tpu.memory_space<vmem>>, vector<64x32xf32>,
    } else {
    }
    %c0_6 = arith.constant 0 : index
    %c0_7 = arith.constant 0 : index
    %c0_8 = arith.constant 0 : index
    %7 = vector.load %arg6[%c0_6, %c0_7, %c0_8] : memref<1x64x32xf32, #tpu.memory_space<vmem>>, vector<1x64x32xf32>
    %8 = vector.shape_cast %7 : vector<1x64x32xf32> to vector<64x32xf32>
    %9 = vector.broadcast %1 : vector<1x32xf32> to vector<64x32xf32>
    %10 = arith.mulf %8, %9 : vector<64x32xf32>
    %11 = vector.broadcast %3 : vector<1x32xf32> to vector<64x32xf32>
    %12 = arith.addf %10, %11 : vector<64x32xf32>
    %13 = arith.truncf %12 : vector<64x32xf32> to vector<64x32xbf16>
    %c0_9 = arith.constant 0 : index
    %c0_10 = arith.constant 0 : index
    %14 = vector.load %arg8[%c0_9, %c0_10] : memref<32x32xbf16, #tpu.memory_space<vmem>>, vector<32x32xbf16>
    %cst = arith.constant dense<0.000000e+00> : vector<64x32xf32>
    %15 = tpu.matmul %13, %14, %cst {dimension_numbers = #tpu.dot_dimension_numbers<[1], [0], [0], [1], [0, 0, 1, 1], [], []>} : vector<64x32xbf16>, vector<32x32xbf16>, vector<64x32xf32> -> vector<64x32xf32>
    %c0_11 = arith.constant 0 : index
    %c0_12 = arith.constant 0 : index
    %16 = vector.load %arg12[%c0_11, %c0_12] : memref<1x32xf32, #tpu.memory_space<vmem>>, vector<1x32xf32>
    %17 = vector.broadcast %16 : vector<1x32xf32> to vector<64x32xf32>
    %18 = arith.addf %15, %17 : vector<64x32xf32>
    %19 = arith.truncf %18 : vector<64x32xf32> to vector<64x32xbf16>
    %c0_13 = arith.constant 0 : index
    %c0_14 = arith.constant 0 : index
    %20 = vector.load %arg9[%c0_13, %c0_14] : memref<32x32xbf16, #tpu.memory_space<vmem>>, vector<32x32xbf16>
    %cst_15 = arith.constant dense<0.000000e+00> : vector<64x32xf32>
    %21 = tpu.matmul %13, %20, %cst_15 {dimension_numbers = #tpu.dot_dimension_numbers<[1], [0], [0], [1], [0, 0, 1, 1], [], []>} : vector<64x32xbf16>, vector<32x32xbf16>, vector<64x32xf32> -> vector<64x32xf32>
    %c0_16 = arith.constant 0 : index
    %c0_17 = arith.constant 0 : index
    %22 = vector.load %arg13[%c0_16, %c0_17] : memref<1x32xf32, #tpu.memory_space<vmem>>, vector<1x32xf32>
    %23 = vector.broadcast %22 : vector<1x32xf32> to vector<64x32xf32>
    %24 = arith.addf %21, %23 : vector<64x32xf32>
    %25 = arith.truncf %24 : vector<64x32xf32> to vector<64x32xbf16>
    %c0_18 = arith.constant 0 : index
    %c0_19 = arith.constant 0 : index
    %26 = vector.load %arg16[%c0_18, %c0_19] : memref<64x32xbf16, #tpu.memory_space<vmem>>, vector<64x32xbf16>
    %cst_20 = arith.constant dense<0.000000e+00> : vector<64x64xf32>
    %27 = tpu.matmul %26, %19, %cst_20 {dimension_numbers = #tpu.dot_dimension_numbers<[1], [1], [0], [0], [0, 0, 1, 0], [], []>} : vector<64x32xbf16>, vector<64x32xbf16>, vector<64x64xf32> -> vector<64x64xf32>
    %c0_21 = arith.constant 0 : index
    %c0_22 = arith.constant 0 : index
    %28 = vector.load %arg17[%c0_21, %c0_22] : memref<64x1xf32, #tpu.memory_space<vmem>>, vector<64x1xf32>
    %cst_23 = arith.constant dense<0xFF800000> : vector<64xf32>
    %29 = vector.multi_reduction <maximumf>, %27, %cst_23 [1] : vector<64x64xf32> to vector<64xf32>
    %30 = vector.shape_cast %29 : vector<64xf32> to vector<64x1xf32>
    %31 = arith.maximumf %28, %30 : vector<64x1xf32>
    %32 = arith.subf %28, %31 : vector<64x1xf32>
    %33 = math.exp %32 : vector<64x1xf32>
    %34 = vector.broadcast %31 : vector<64x1xf32> to vector<64x64xf32>
    %35 = arith.subf %27, %34 : vector<64x64xf32>
    %36 = math.exp %35 : vector<64x64xf32>
    %c0_24 = arith.constant 0 : index
    %c0_25 = arith.constant 0 : index
    %37 = vector.load %arg18[%c0_24, %c0_25] : memref<64x1xf32, #tpu.memory_space<vmem>>, vector<64x1xf32>
    %38 = arith.mulf %33, %37 : vector<64x1xf32>
    %cst_26 = arith.constant dense<0.000000e+00> : vector<64xf32>
    %39 = vector.multi_reduction <add>, %36, %cst_26 [1] : vector<64x64xf32> to vector<64xf32>
    %40 = vector.shape_cast %39 : vector<64xf32> to vector<64x1xf32>
    %41 = arith.addf %38, %40 : vector<64x1xf32>
    %c0_27 = arith.constant 0 : index
    %c0_28 = arith.constant 0 : index
    %42 = vector.load %arg18[%c0_27, %c0_28] : memref<64x1xf32, #tpu.memory_space<vmem>>, vector<64x1xf32>
    tpu.vector_store %arg18[%c0_27, %c0_28], %41 {strides = array<i32>} : memref<64x1xf32, #tpu.memory_space<vmem>>, vector<64x1xf32>,
    %c0_29 = arith.constant 0 : index
    %c0_30 = arith.constant 0 : index
    %43 = vector.load %arg19[%c0_29, %c0_30] : memref<64x32xf32, #tpu.memory_space<vmem>>, vector<64x32xf32>
    %44 = vector.broadcast %33 : vector<64x1xf32> to vector<64x32xf32>
    %45 = arith.mulf %44, %43 : vector<64x32xf32>
    %46 = arith.truncf %36 : vector<64x64xf32> to vector<64x64xbf16>
    %cst_31 = arith.constant dense<0.000000e+00> : vector<64x32xf32>
    %47 = tpu.matmul %46, %25, %cst_31 {dimension_numbers = #tpu.dot_dimension_numbers<[1], [0], [0], [1], [0, 0, 1, 1], [], []>} : vector<64x64xbf16>, vector<64x32xbf16>, vector<64x32xf32> -> vector<64x32xf32>
    %48 = arith.addf %45, %47 : vector<64x32xf32>
    %c0_32 = arith.constant 0 : index
    %c0_33 = arith.constant 0 : index
    %49 = vector.load %arg19[%c0_32, %c0_33] : memref<64x32xf32, #tpu.memory_space<vmem>>, vector<64x32xf32>
    tpu.vector_store %arg19[%c0_32, %c0_33], %48 {strides = array<i32>} : memref<64x32xf32, #tpu.memory_space<vmem>>, vector<64x32xf32>,
    %c0_34 = arith.constant 0 : index
    %c0_35 = arith.constant 0 : index
    %50 = vector.load %arg17[%c0_34, %c0_35] : memref<64x1xf32, #tpu.memory_space<vmem>>, vector<64x1xf32>
    tpu.vector_store %arg17[%c0_34, %c0_35], %31 {strides = array<i32>} : memref<64x1xf32, #tpu.memory_space<vmem>>, vector<64x1xf32>,
    %c0_i32_36 = arith.constant 0 : i32
    %51 = arith.cmpi eq, %arg2, %c0_i32_36 : i32
    %52 = arith.extui %51 : i1 to i32
    %c0_i32_37 = arith.constant 0 : i32
    %53 = arith.cmpi ne, %52, %c0_i32_37 : i32
    scf.if %53 {
      %c0_38 = arith.constant 0 : index
      %c0_39 = arith.constant 0 : index
      %54 = vector.load %arg19[%c0_38, %c0_39] : memref<64x32xf32, #tpu.memory_space<vmem>>, vector<64x32xf32>
      %c0_40 = arith.constant 0 : index
      %c0_41 = arith.constant 0 : index
      %55 = vector.load %arg18[%c0_40, %c0_41] : memref<64x1xf32, #tpu.memory_space<vmem>>, vector<64x1xf32>
      %56 = tpu.reciprocal %55 {approx = true} : vector<64x1xf32> -> vector<64x1xf32>
      %57 = vector.broadcast %56 : vector<64x1xf32> to vector<64x32xf32>
      %58 = arith.mulf %54, %57 : vector<64x32xf32>
      %59 = arith.truncf %58 : vector<64x32xf32> to vector<64x32xbf16>
      %c0_42 = arith.constant 0 : index
      %c0_43 = arith.constant 0 : index
      %60 = vector.load %arg10[%c0_42, %c0_43] : memref<32x32xbf16, #tpu.memory_space<vmem>>, vector<32x32xbf16>
      %cst_44 = arith.constant dense<0.000000e+00> : vector<64x32xf32>
      %61 = tpu.matmul %59, %60, %cst_44 {dimension_numbers = #tpu.dot_dimension_numbers<[1], [0], [0], [1], [0, 0, 1, 1], [], []>} : vector<64x32xbf16>, vector<32x32xbf16>, vector<64x32xf32> -> vector<64x32xf32>
      %c0_45 = arith.constant 0 : index
      %c0_46 = arith.constant 0 : index
      %62 = vector.load %arg14[%c0_45, %c0_46] : memref<1x32xf32, #tpu.memory_space<vmem>>, vector<1x32xf32>
      %63 = vector.broadcast %62 : vector<1x32xf32> to vector<64x32xf32>
      %64 = arith.addf %61, %63 : vector<64x32xf32>
      %c0_47 = arith.constant 0 : index
      %c0_48 = arith.constant 0 : index
      %c0_49 = arith.constant 0 : index
      %65 = vector.load %arg5[%c0_47, %c0_48, %c0_49] : memref<1x64x32xf32, #tpu.memory_space<vmem>>, vector<1x64x32xf32>
      %66 = vector.shape_cast %65 : vector<1x64x32xf32> to vector<64x32xf32>
      %67 = arith.addf %64, %66 : vector<64x32xf32>
      %c0_50 = arith.constant 0 : index
      %c0_51 = arith.constant 0 : index
      %c0_52 = arith.constant 0 : index
      %68 = vector.load %arg15[%c0_50, %c0_51, %c0_52] : memref<1x64x32xf32, #tpu.memory_space<vmem>>, vector<1x64x32xf32>
      %69 = vector.shape_cast %68 : vector<1x64x32xf32> to vector<64x32xf32>
      %70 = vector.shape_cast %67 : vector<64x32xf32> to vector<1x64x32xf32>
      tpu.vector_store %arg15[%c0_50, %c0_51, %c0_52], %70 {strides = array<i32>} : memref<1x64x32xf32, #tpu.memory_space<vmem>>, vector<1x64x32xf32>,
    } else {
    }
    return
  }
  func.func @transform_0(%arg0: i32, %arg1: i32, %arg2: i32) -> (i32, i32, i32) {
    %c0_i32 = arith.constant 0 : i32
    %c0_i32_0 = arith.constant 0 : i32
    %c0_i32_1 = arith.constant 0 : i32
    return %arg0, %c0_i32, %c0_i32_0 : i32, i32, i32
  }
  func.func @transform_1(%arg0: i32, %arg1: i32, %arg2: i32) -> (i32, i32, i32) {
    %c0_i32 = arith.constant 0 : i32
    %c0_i32_0 = arith.constant 0 : i32
    %c0_i32_1 = arith.constant 0 : i32
    return %arg0, %c0_i32, %c0_i32_0 : i32, i32, i32
  }
  func.func @transform_2(%arg0: i32, %arg1: i32, %arg2: i32) -> (i32, i32, i32) {
    %c0_i32 = arith.constant 0 : i32
    %c0_i32_0 = arith.constant 0 : i32
    return %arg0, %arg1, %c0_i32 : i32, i32, i32
  }
  func.func @transform_3(%arg0: i32, %arg1: i32, %arg2: i32) -> (i32, i32, i32) {
    %c0_i32 = arith.constant 0 : i32
    %c0_i32_0 = arith.constant 0 : i32
    return %arg0, %arg2, %c0_i32 : i32, i32, i32
  }
  func.func @transform_4(%arg0: i32, %arg1: i32, %arg2: i32) -> (i32, i32) {
    %c0_i32 = arith.constant 0 : i32
    %c0_i32_0 = arith.constant 0 : i32
    %c0_i32_1 = arith.constant 0 : i32
    return %c0_i32, %c0_i32_0 : i32, i32
  }
  func.func @transform_5(%arg0: i32, %arg1: i32, %arg2: i32) -> (i32, i32) {
    %c0_i32 = arith.constant 0 : i32
    %c0_i32_0 = arith.constant 0 : i32
    %c0_i32_1 = arith.constant 0 : i32
    return %c0_i32, %c0_i32_0 : i32, i32
  }
  func.func @transform_6(%arg0: i32, %arg1: i32, %arg2: i32) -> (i32, i32) {
    %c0_i32 = arith.constant 0 : i32
    %c0_i32_0 = arith.constant 0 : i32
    %c0_i32_1 = arith.constant 0 : i32
    return %c0_i32, %c0_i32_0 : i32, i32
  }
  func.func @transform_7(%arg0: i32, %arg1: i32, %arg2: i32) -> (i32, i32) {
    %c0_i32 = arith.constant 0 : i32
    %c0_i32_0 = arith.constant 0 : i32
    %c0_i32_1 = arith.constant 0 : i32
    return %c0_i32, %c0_i32_0 : i32, i32
  }
  func.func @transform_8(%arg0: i32, %arg1: i32, %arg2: i32) -> (i32, i32) {
    %c0_i32 = arith.constant 0 : i32
    %c0_i32_0 = arith.constant 0 : i32
    %c0_i32_1 = arith.constant 0 : i32
    return %c0_i32, %c0_i32_0 : i32, i32
  }
  func.func @transform_9(%arg0: i32, %arg1: i32, %arg2: i32) -> (i32, i32) {
    %c0_i32 = arith.constant 0 : i32
    %c0_i32_0 = arith.constant 0 : i32
    %c0_i32_1 = arith.constant 0 : i32
    return %c0_i32, %c0_i32_0 : i32, i32
  }
  func.func @transform_10(%arg0: i32, %arg1: i32, %arg2: i32) -> (i32, i32) {
    %c0_i32 = arith.constant 0 : i32
    %c0_i32_0 = arith.constant 0 : i32
    %c0_i32_1 = arith.constant 0 : i32
    return %c0_i32, %c0_i32_0 : i32, i32
  }
  func.func @transform_11(%arg0: i32, %arg1: i32, %arg2: i32) -> (i32, i32) {
    %c0_i32 = arith.constant 0 : i32
    %c0_i32_0 = arith.constant 0 : i32
    %c0_i32_1 = arith.constant 0 : i32
    return %c0_i32, %c0_i32_0 : i32, i32
  }
  func.func @transform_12(%arg0: i32, %arg1: i32, %arg2: i32) -> (i32, i32, i32) {
    %c0_i32 = arith.constant 0 : i32
    %c0_i32_0 = arith.constant 0 : i32
    return %arg0, %arg1, %c0_i32 : i32, i32, i32
  }
}

</mosaic_0001>

<bundles_post_ra>
// kernel: attention_block_forward.1
= control target key start
LH: loop header
LB: loop body
LE: loop exit
PB: predicated region body
PF: predicated region fallthrough
CT: control target
= control target key end

     0   :  { %s2363_s0 = inlined_call_operand.vmem [shape: f32[2,1,32], index: 0, kind: input, shape index: {}]   ;;  %s2364_s1 = inlined_call_operand.vmem [shape: f32[2,1,32], index: 1, kind: input, shape index: {}]   ;;  %s2365_s2 = inlined_call_operand.vmem [shape: f32[2,64,32], index: 2, kind: input, shape index: {}, may-alias: {2,3}]   ;;  %s2366_s3 = inlined_call_operand.vmem [shape: f32[2,64,32], index: 3, kind: input, shape index: {}, may-alias: {2,3}]   ;;  %s2367_s4 = inlined_call_operand.vmem [shape: bf16[32,32], index: 4, kind: input, shape index: {}]   ;;  %s2368_s5 = inlined_call_operand.vmem [shape: bf16[32,32], index: 5, kind: input, shape index: {}]   ;;  %s2369_s6 = inlined_call_operand.vmem [shape: bf16[32,32], index: 6, kind: input, shape index: {}]   ;;  %s2370_s7 = inlined_call_operand.vmem [shape: bf16[32,32], index: 7, kind: input, shape index: {}]   ;;  %s2371_s8 = inlined_call_operand.vmem [shape: f32[1,32], index: 8, kind: input, shape index: {}]   ;;  %s2372_s9 = inlined_call_operand.vmem [shape: f32[1,32], index: 9, kind: input, shape index: {}]   ;;  %s2373_s10 = inlined_call_operand.vmem [shape: f32[1,32], index: 10, kind: input, shape index: {}]   ;;  %s2374_s11 = inlined_call_operand.vmem [shape: f32[1,32], index: 11, kind: input, shape index: {}]   ;;  %s2375_s12 = inlined_call_operand.hbm [shape: f32[2,64,32], index: 12, kind: output, shape index: {}]  }
   0x1   :  { %2380 = sst [smem:[#allocation14_spill]] %s2368_s5 }
   0x2   :  { %17 = vsyncpa [#allocation7], 0 }
   0x3   :  { %19 = vsyncpa [#allocation7 + $0x1], 0  ;;  %s1886_s21 = smov 0   ;;  %s1888_s22 = smov 0  }
   0x4   :  { %s1890_s23 = smov 0   ;;  %s1892_s24 = smov 0  }
   0x5   :  { %s1894_s25 = smov 0   ;;  %s1896_s26 = smov 0  }
   0x6 LB: > { %2381 = sst [smem:[#allocation9_spill]] %s1802_s23  ;;  %s1504_s27 = sadd.s32 4294967295, %s1814_s26   ;;  %s1814_s26 = sphi %s1896_s26, %s25_s26   ;;  %s1810_s25 = sphi %s1894_s25, %s2393_s25   ;;  %s1806_s24 = sphi %s1892_s24, %s2392_s24   ;;  %s1802_s23 = sphi %s1890_s23, %s2391_s23   ;;  %s1798_s22 = sphi %s1888_s22, %s2395_s22   ;;  %s1794_s21 = sphi %s1886_s21, %s2394_s21  }
   0x7   : > { %2382 = sst [smem:[#allocation10_spill]] %s1810_s25  ;;  %s1505_s28 = sadd.s32 4294967294, %s1814_s26  }
   0x8   : > { %s44_s29 = sadd.s32 1, %s1810_s25  ;;  %s329_s30 = sadd.s32 1, %s1802_s23 }
   0x9   : > { %p46_p0 = scmp.ge.s32.totalorder %s44_s29, 2  ;;  %p339_p1 = scmp.ne.s32.totalorder %s1802_s23, %s1798_s22 }
   0xa   : > { %p340_p2 = scmp.eq.s32.totalorder %s1504_s27, 1  ;;  %p345_p3 = scmp.ne.s32.totalorder %s1798_s22, %s1794_s21 }
   0xb   : > { %s2397_s29 = smov (%p46_p0, %s44_s29), 0  ;;  %p346_p5 = scmp.eq.s32.totalorder %s1505_s28, 1 }
   0xc   : > { %2383 = sst [smem:[#allocation11_spill]] %s2397_s29  ;;  %p1926_p4 = por %p340_p2, %p339_p1 }
   0xd   : > { %s324_s14 = ssub.s32 %s1810_s25, %s2397_s29  ;;  %p1508_p6 = scmp.ge.s32.totalorder %s1814_s26, 1 }
   0xe   : > { %p327_p7 = scmp.eq.s32.totalorder %s324_s14, 0  ;;  %p1933_p8 = por %p346_p5, %p345_p3 }
   0xf   : > { %p426_p9 = scmp.lt.s32.totalorder %s1814_s26, 3 }
  0x10   : > { %s2385_s15 = scalar_select %p1933_p8, 1, 0 }
  0x11   : > { %s1939_s16 = scalar_select %p327_p7, %s1802_s23, %s329_s30  }
  0x12   : > { %2386 = sst [smem:[#allocation12_spill]] %s2385_s15  ;;  %p427_p10 = pnand %p1508_p6, %p426_p9 }
  0x13   : > { %2387 = sst [smem:[#allocation13_spill]] %s1939_s16  ;;  %p487_p11 = scmp.lt.s32.totalorder (!%p427_p10), %s1806_s24, 1 }
  0x14   : > { %430 = sbr.rel (%p427_p10) target bundleno = 1083 (0x43b), region = 68  ;;  %s2388_s5 = sld [smem:[#allocation14_spill]] (!%p427_p10) }
  0x15   : > { %s1605_s18 = sshll.u32 (!%p427_p10), %s1806_s24, 6 }
  0x16   : > { %s1382_s27 = scalar_lea.hbm (!%p427_p10), %s2375_s12, %s1605_s18 }
  0x17   : > { %s1385_s29 = sshll.u32 (!%p427_p10), %s1382_s27, 4  ;;  %s1386_s29 = int_to_ptr.hbm [resolvable:$true] %s1385_s29 }
  0x19   : > { %v1594_v1 = vld [vmem:[%s2367_s4 + $0x8] sm:$0xff]  ;;  %s488_s30 = scalar_select %p487_p11, %s1806_s24, 1  ;;  %v1593_v3 = vld [vmem:[%s2367_s4] sm:$0xff]  ;;  %vm575_vm0 = vcmask 261120   ;;  %vm625_vm1 = vcmask 257024   ;;  %vm901_vm2 = vcmask 523264  }
  0x1a   : > { %v1596_v0 = vld [vmem:[%s2388_s5 + $0x8] sm:$0xff]  ;;  %v1595_v2 = vld [vmem:[%s2388_s5] sm:$0xff]  ;;  %1606 = vmatpush.bf16.msra.mxu1 %v1594_v1  ;;  %594 = vmatpush.bf16.msra.mxu0 %v1594_v1  ;;  %vm634_vm3 = vcmask 7168  }
  0x1b   : > { %1611 = vmatpush.bf16.msra.mxu3 %v1596_v0  ;;  %1607 = vmatpush.bf16.msra.mxu2 %v1594_v1  ;;  %s489_s25 = scalar_lea.vmem %s2363_s0, %s488_s30  ;;  %s492_s20 = scalar_lea.vmem %s2364_s1, %s488_s30  ;;  %v1680_v62 = vld [vmem:[%s2371_s8] ss:$0 sm:$0xff] }
  0x1c   : > { %s1591_s23 = sshll.u32 %s488_s30, 6  ;;  %v1971_v4 = vld [vmem:[%s489_s25] ss:$0 sm:$0xff]  ;;  %s484_s25 = sand.u32 1, %s1798_s22  }
  0x1d   : > { %s1964_s5 = scalar_lea.vmem %s2365_s2, %s1591_s23  ;;  %s1969_s14 = scalar_lea.vmem %s2366_s3, %s1591_s23  ;;  %v1973_v5 = vld [vmem:[%s492_s20] ss:$0 sm:$0xff] }
  0x1e   : > { %1608 = vmatpush.bf16.msra.mxu1 %v1593_v3  ;;  %v663_v6 = vld [vmem:[%s1969_s14 + $0x20] sm:$0xff]  ;;  %v664_v7 = vld [vmem:[%s1969_s14 + $0x28] sm:$0xff]  ;;  %v523_v8 = vld [vmem:[%s1964_s5 + $0x10] sm:$0xff]  ;;  %595 = vmatpush.bf16.msra.mxu0 %v1593_v3  ;;  %s1509_s30 = sshll.u32 %s484_s25, 6  ;;  %s1369_s24 = scalar_lea.sflag [#allocation7], %s484_s25 }
  0x1f   : > { %1613 = vmatpush.bf16.msra.mxu3 %v1595_v2  ;;  %v674_v9 = vmul.f32 %v1971_v4, %v663_v6  ;;  %v675_v10 = vmul.f32 %v1971_v4, %v664_v7  ;;  %v524_v11 = vld [vmem:[%s1964_s5 + $0x18] sm:$0xff]  ;;  %v534_v12 = vmul.f32 %v1971_v4, %v523_v8  ;;  %1609 = vmatpush.bf16.msra.mxu2 %v1593_v3  ;;  %v521_v14 = vld [vmem:[%s1964_s5] sm:$0xff]  ;;  %v522_v15 = vld [vmem:[%s1964_s5 + $0x8] sm:$0xff]  ;;  %s2299_s17 = scalar_lea.vmem [#allocation6], %s1509_s30  ;;  %s1756_s30 = scalar_lea.hbm %s2375_s12, 128 }
  0x20   : > { %v535_v13 = vmul.f32 %v1971_v4, %v524_v11  ;;  %v532_v19 = vmul.f32 %v1971_v4, %v521_v14  ;;  %v533_v21 = vmul.f32 %v1971_v4, %v522_v15  ;;  %v525_v22 = vld [vmem:[%s1964_s5 + $0x20] sm:$0xff]  ;;  %v526_v25 = vld [vmem:[%s1964_s5 + $0x28] sm:$0xff]  ;;  %v665_v29 = vld [vmem:[%s1969_s14 + $0x30] sm:$0xff]  ;;  %s1383_s28 = sshll.u32 %s2299_s17, 4  ;;  %s1384_s28 = int_to_ptr.vmem [resolvable:$true] %s1383_s28 }
  0x21   : > { %v685_v16 = vadd.f32 %v1973_v5, %v674_v9  ;;  %v686_v17 = vadd.f32 %v1973_v5, %v675_v10  ;;  %v545_v18 = vadd.f32 %v1973_v5, %v534_v12  ;;  %v536_v28 = vmul.f32 %v1971_v4, %v525_v22  ;;  %v666_v30 = vld [vmem:[%s1969_s14 + $0x38] sm:$0xff]  ;;  %v661_v33 = vld [vmem:[%s1969_s14 + $0x10] sm:$0xff]  ;;  %v659_v39 = vld [vmem:[%s1969_s14] sm:$0xff] }
  0x22   : > { %1610 = vmatpush.bf16.msrb.mxu1 %v1596_v0  ;;  %732 = vmatpush.bf16.msrb.mxu0 %v1596_v0  ;;  %v546_v20 = vadd.f32 %v1973_v5, %v535_v13  ;;  %v543_v24 = vadd.f32 %v1973_v5, %v532_v19  ;;  %v544_v27 = vadd.f32 %v1973_v5, %v533_v21  ;;  %v662_v34 = vld [vmem:[%s1969_s14 + $0x18] sm:$0xff]  ;;  %v660_v40 = vld [vmem:[%s1969_s14 + $0x8] sm:$0xff]  ;;  %v527_v48 = vld [vmem:[%s1964_s5 + $0x30] sm:$0xff]  ;;  %s1750_s14 = sshra.s32 %s1386_s29, 4  ;;  %s1751_s14 = int_to_ptr.hbm [resolvable:$true] %s1750_s14 }
  0x23   : > { %v1992_v23 = vpack.c.bf16 %v686_v17, %v685_v16  ;;  %v537_v32 = vmul.f32 %v1971_v4, %v526_v25  ;;  %v547_v35 = vadd.f32 %v1973_v5, %v536_v28  ;;  %v676_v37 = vmul.f32 %v1971_v4, %v665_v29  ;;  %v528_v49 = vld [vmem:[%s1964_s5 + $0x38] sm:$0xff]  ;;  %v1679_v14 = vld [vmem:[%s2372_s9] ss:$0 sm:$0xff]  ;;  %s1752_s23 = scalar_lea.hbm %s1751_s14, 64  ;;  %p1757_p1 = scmp.lt.s32.totalorder %s1751_s14, %s2375_s12 }
  0x24   : > { %v552_v26 = vpack.c.bf16 %v546_v20, %v545_v18  ;;  %v551_v31 = vpack.c.bf16 %v544_v27, %v543_v24  ;;  %v677_v38 = vmul.f32 %v1971_v4, %v666_v30  ;;  %v672_v41 = vmul.f32 %v1971_v4, %v661_v33  ;;  %p1753_p12 = scmp.ne.s32.totalorder %s1751_s14, %s1752_s23  ;;  %p1758_p2 = scmp.lt.s32.totalorder %s1756_s30, %s1752_s23 }
  0x25   : > { %1536 = vmatmul.msk.bf16.vlgmr.msra.gmra.mxu3 %vm575_vm0, %v1992_v23  ;;  %v548_v36 = vadd.f32 %v1973_v5, %v537_v32  ;;  %v673_v42 = vmul.f32 %v1971_v4, %v662_v34  ;;  %v670_v44 = vmul.f32 %v1971_v4, %v659_v39  ;;  %v671_v45 = vmul.f32 %v1971_v4, %v660_v40 }
  0x26   : > { %1612 = vmatpush.bf16.msrb.mxu1 %v1595_v2  ;;  %733 = vmatpush.bf16.msrb.mxu0 %v1595_v2  ;;  %v687_v46 = vadd.f32 %v1973_v5, %v676_v37  ;;  %v688_v47 = vadd.f32 %v1973_v5, %v677_v38  ;;  %v683_v50 = vadd.f32 %v1973_v5, %v672_v41  ;;  %p1754_p13 = pnand %p1753_p12, %p1926_p4  ;;  %p1759_p3 = por %p1758_p2, %p1757_p1 }
  0x27   : > { %1523 = vmatmul.msk.bf16.vlgmr.msra.gmra.mxu1 %vm575_vm0, %v552_v26  ;;  %1522 = vmatmul.msk.bf16.vlgmr.msra.gmra.mxu0 %vm575_vm0, %v551_v31  ;;  %v553_v43 = vpack.c.bf16 %v548_v36, %v547_v35  ;;  %v684_v51 = vadd.f32 %v1973_v5, %v673_v42  ;;  %v681_v52 = vadd.f32 %v1973_v5, %v670_v44 }
  0x28   : > { %v682_v53 = vadd.f32 %v1973_v5, %v671_v45  ;;  %v538_v54 = vmul.f32 %v1971_v4, %v527_v48  ;;  %v539_v55 = vmul.f32 %v1971_v4, %v528_v49  ;;  %v2028_v56 = vpack.c.bf16 %v688_v47, %v687_v46  ;;  %p1755_p0 = pneg %p1754_p13 }
  0x29   : > { %1524 = vmatmul.msk.bf16.vlgmr.msra.gmra.mxu2 %vm575_vm0, %v553_v43  ;;  %v2030_v57 = vpack.c.bf16 %v684_v51, %v683_v50 }
  0x2a   : > { %v2032_v58 = vpack.c.bf16 %v682_v53, %v681_v52  ;;  %v549_v59 = vadd.f32 %v1973_v5, %v538_v54  ;;  %v550_v60 = vadd.f32 %v1973_v5, %v539_v55  ;;  %p1760_p5 = pnand %p1759_p3, %p1755_p0 }
  0x2c   : > { %v554_v61 = vpack.c.bf16 %v550_v60, %v549_v59  ;;  %v1598_v59 = vld [vmem:[%s2369_s6 + $0x8] sm:$0xff] }
  0x2d   : > { %785 = vmatpush.bf16.msrb.mxu2 %v1598_v59 }
  0x35   : > { %1537 = vmatmul.msk.bf16.gmra.mxu3 %vm575_vm0, %v2028_v56 }
  0x37   : > { %1535 = vmatmul.msk.bf16.vlgmr.msrb.gmra.mxu1 %vm575_vm0, %v2030_v57  ;;  %1534 = vmatmul.msk.bf16.vlgmr.msrb.gmra.mxu0 %vm575_vm0, %v2032_v58 }
  0x39   : > { %1525 = vmatmul.msk.bf16.gmra.mxu2 %vm575_vm0, %v554_v61  ;;  %v1597_v61 = vld [vmem:[%s2369_s6] sm:$0xff] }
  0x3a   : > { %786 = vmatpush.bf16.msrb.mxu2 %v1597_v61 }
  0x49   : > { %1546 = vmatmul.msk.bf16.vlgmr.msrb.gmra.mxu2 %vm575_vm0, %v2032_v58 }
  0x59   : > { %1547 = vmatmul.msk.bf16.gmra.mxu2 %vm575_vm0, %v2030_v57 }
  0x69   : > { %1548 = vmatmul.msk.bf16.gmra.mxu2 %vm575_vm0, %v1992_v23 }
  0x79   : > { %1549 = vmatmul.msk.bf16.gmra.mxu2 %vm575_vm0, %v2028_v56 }
  0xa4   : > { %v602_v63 = vpop.f32.mrf.mxu1  ;;  %v597_v1 = vpop.f32.mrf.mxu0 }
  0xa5   : > { %v603_v0 = vadd.f32 %v1680_v62, %v602_v63  ;;  %v598_v3 = vadd.f32 %v1680_v62, %v597_v1 }
  0xa7   : > { %v619_v2 = vpack.c.bf16 %v603_v0, %v603_v0  ;;  %v617_v5 = vpack.c.bf16 %v598_v3, %v598_v3 }
  0xa8   : > { %v745_v4 = vpop.f32.mrf.mxu3 }
  0xa9   : > { %628 = vst.msk [vmem:[#allocation2 + $0x8] sm:$0xf] %vm625_vm1, %v619_v2  ;;  %v746_v25 = vadd.f32 %v1679_v14, %v745_v4  ;;  %v1816_v4 = vmov -inf  }
  0xaa   : > { %626 = vst.msk [vmem:[#allocation2] sm:$0xf] %vm625_vm1, %v617_v5 }
  0xab   : > { %635 = vst.msk [vmem:[#allocation3] sm:$0xff] %vm634_vm3, %v1816_v4 }
  0xac   : > { %v604_v6 = vpop.f32.mrf.mxu1  ;;  %v599_v8 = vpop.f32.mrf.mxu0  ;;  %636 = vst.msk [vmem:[#allocation3 + $0x8] sm:$0xff] %vm634_vm3, %v1816_v4 }
  0xad   : > { %v605_v7 = vadd.f32 %v1680_v62, %v604_v6  ;;  %v600_v10 = vadd.f32 %v1680_v62, %v599_v8  ;;  %v607_v22 = vpop.f32.mrf.mxu2  ;;  %637 = vst.msk [vmem:[#allocation3 + $0x10] sm:$0xff] %vm634_vm3, %v1816_v4 }
  0xae   : > { %v608_v24 = vadd.f32 %v1680_v62, %v607_v22  ;;  %638 = vst.msk [vmem:[#allocation3 + $0x18] sm:$0xff] %vm634_vm3, %v1816_v4 }
  0xaf   : > { %v620_v9 = vpack.c.bf16 %v605_v7, %v605_v7  ;;  %v618_v12 = vpack.c.bf16 %v600_v10, %v600_v10  ;;  %639 = vst.msk [vmem:[#allocation3 + $0x20] sm:$0xff] %vm634_vm3, %v1816_v4  ;;  %v1818_v10 = vmov 0.0  }
  0xb0   : > { %v747_v11 = vpop.f32.mrf.mxu3  ;;  %v621_v27 = vpack.c.bf16 %v608_v24, %v608_v24  ;;  %640 = vst.msk [vmem:[#allocation3 + $0x28] sm:$0xff] %vm634_vm3, %v1816_v4 }
  0xb1   : > { %629 = vst.msk [vmem:[#allocation2 + $0xc] sm:$0xf] %vm625_vm1, %v620_v9  ;;  %v748_v20 = vadd.f32 %v1679_v14, %v747_v11  ;;  %v1817_v9 = vmov 0  }
  0xb2   : > { %627 = vst.msk [vmem:[#allocation2 + $0x4] sm:$0xf] %vm625_vm1, %v618_v12  ;;  %1674 = vset.pattern.permute.xlu0 %v1817_v9  ;;  %1675 = vset.pattern.permute.xlu1 %v1817_v9  ;;  %v2135_v23 = vld [vmem:[#allocation3] sm:$0xff] }
  0xb3   : > { %v757_v28 = vpack.c.bf16 %v748_v20, %v746_v25  ;;  %630 = vst.msk [vmem:[#allocation2 + $0x10] sm:$0xf] %vm625_vm1, %v621_v27  ;;  %1676 = vset.pattern.permute.xlu2 %v1817_v9 }
  0xb4   : > { %v740_v15 = vpop.f32.mrf.mxu1  ;;  %v735_v26 = vpop.f32.mrf.mxu0  ;;  %641 = vst.msk [vmem:[#allocation3 + $0x30] sm:$0xff] %vm634_vm3, %v1816_v4 }
  0xb5   : > { %v741_v30 = vadd.f32 %v1679_v14, %v740_v15  ;;  %v859_v32 = vsel %vm575_vm0, %v757_v28, 0  ;;  %v736_v35 = vadd.f32 %v1679_v14, %v735_v26  ;;  %v609_v38 = vpop.f32.mrf.mxu2  ;;  %642 = vst.msk [vmem:[#allocation3 + $0x38] sm:$0xff] %vm634_vm3, %v1816_v4 }
  0xb6   : > { %v610_v39 = vadd.f32 %v1680_v62, %v609_v38  ;;  %645 = vst.msk [vmem:[#allocation4 + $0x10] sm:$0xff] %vm634_vm3, %v1818_v10  ;;  %v2175_v26 = vld [vmem:[#allocation3 + $0x20] sm:$0xff] }
  0xb7   : > { %643 = vst.msk [vmem:[#allocation4] sm:$0xff] %vm634_vm3, %v1818_v10 }
  0xb8   : > { %v750_v13 = vpop.f32.mrf.mxu3  ;;  %v622_v40 = vpack.c.bf16 %v610_v39, %v610_v39  ;;  %v1600_v50 = vld [vmem:[#allocation2 + $0x8] sm:$0xff]  ;;  %644 = vst.msk [vmem:[#allocation4 + $0x8] sm:$0xff] %vm634_vm3, %v1818_v10 }
  0xb9   : > { %v751_v17 = vadd.f32 %v1679_v14, %v750_v13  ;;  %v1599_v46 = vld [vmem:[#allocation2] sm:$0xff]  ;;  %646 = vst.msk [vmem:[#allocation4 + $0x18] sm:$0xff] %vm634_vm3, %v1818_v10  ;;  %v2145_v13 = vld [vmem:[#allocation3 + $0x8] sm:$0xff] }
  0xba   : > { %631 = vst.msk [vmem:[#allocation2 + $0x14] sm:$0xf] %vm625_vm1, %v622_v40 }
  0xbb   : > { %647 = vst.msk [vmem:[#allocation4 + $0x20] sm:$0xff] %vm634_vm3, %v1818_v10 }
  0xbc   : > { %v742_v29 = vpop.f32.mrf.mxu1  ;;  %v737_v34 = vpop.f32.mrf.mxu0  ;;  %648 = vst.msk [vmem:[#allocation4 + $0x28] sm:$0xff] %vm634_vm3, %v1818_v10 }
  0xbd   : > { %v743_v31 = vadd.f32 %v1679_v14, %v742_v29  ;;  %v738_v36 = vadd.f32 %v1679_v14, %v737_v34  ;;  %v612_v43 = vpop.f32.mrf.mxu2  ;;  %649 = vst.msk [vmem:[#allocation4 + $0x30] sm:$0xff] %vm634_vm3, %v1818_v10 }
  0xbe   : > { %v613_v44 = vadd.f32 %v1680_v62, %v612_v43  ;;  %650 = vst.msk [vmem:[#allocation4 + $0x38] sm:$0xff] %vm634_vm3, %v1818_v10 }
  0xbf   : > { %v756_v33 = vpack.c.bf16 %v743_v31, %v741_v30  ;;  %v755_v41 = vpack.c.bf16 %v738_v36, %v736_v35  ;;  %651 = vst.msk [vmem:[#allocation5] sm:$0xff] %vm575_vm0, %v1818_v10  ;;  %v2185_v31 = vld [vmem:[#allocation3 + $0x28] sm:$0xff]  ;;  %v2195_v36 = vld [vmem:[#allocation3 + $0x30] sm:$0xff] }
  0xc0   : > { %v752_v16 = vpop.f32.mrf.mxu3  ;;  %v623_v45 = vpack.c.bf16 %v613_v44, %v613_v44  ;;  %652 = vst.msk [vmem:[#allocation5 + $0x8] sm:$0xff] %vm575_vm0, %v1818_v10 }
  0xc1   : > { %v753_v18 = vadd.f32 %v1679_v14, %v752_v16  ;;  %v856_v37 = vsel %vm575_vm0, %v756_v33, 0  ;;  %v853_v42 = vsel %vm575_vm0, %v755_v41, 0  ;;  %v1601_v51 = vld [vmem:[#allocation2 + $0x10] sm:$0xff]  ;;  %653 = vst.msk [vmem:[#allocation5 + $0x10] sm:$0xff] %vm575_vm0, %v1818_v10  ;;  %v2205_v41 = vld [vmem:[#allocation3 + $0x38] sm:$0xff] }
  0xc2   : > { %632 = vst.msk [vmem:[#allocation2 + $0x18] sm:$0xf] %vm625_vm1, %v623_v45 }
  0xc3   : > { %v758_v19 = vpack.c.bf16 %v753_v18, %v751_v17  ;;  %654 = vst.msk [vmem:[#allocation5 + $0x18] sm:$0xff] %vm575_vm0, %v1818_v10  ;;  %v2155_v17 = vld [vmem:[#allocation3 + $0x10] sm:$0xff] }
  0xc4   : > { %655 = vst.msk [vmem:[#allocation5 + $0x20] sm:$0xff] %vm575_vm0, %v1818_v10 }
  0xc5   : > { %v862_v21 = vsel %vm575_vm0, %v758_v19, 0  ;;  %v614_v47 = vpop.f32.mrf.mxu2  ;;  %656 = vst.msk [vmem:[#allocation5 + $0x28] sm:$0xff] %vm575_vm0, %v1818_v10 }
  0xc6   : > { %868 = vmatpush.bf16.xpose.msrb.mxu3 %v862_v21  ;;  %v615_v48 = vadd.f32 %v1680_v62, %v614_v47  ;;  %657 = vst.msk [vmem:[#allocation5 + $0x30] sm:$0xff] %vm575_vm0, %v1818_v10  ;;  %v2165_v21 = vld [vmem:[#allocation3 + $0x18] sm:$0xff] }
  0xc7   : > { %658 = vst.msk [vmem:[#allocation5 + $0x38] sm:$0xff] %vm575_vm0, %v1818_v10 }
  0xc8   : > { %v624_v49 = vpack.c.bf16 %v615_v48, %v615_v48 }
  0xca   : > { %633 = vst.msk [vmem:[#allocation2 + $0x1c] sm:$0xf] %vm625_vm1, %v624_v49  ;;  %v1681_v49 = vld [vmem:[%s2373_s10] ss:$0 sm:$0xff] }
  0xcd   : > { %v788_v27 = vpop.f32.mrf.mxu2 }
  0xce   : > { %869 = vmatpush.bf16.xpose.msrb.mxu3 %v859_v32 }
  0xd1   : > { %v1602_v52 = vld [vmem:[#allocation2 + $0x18] sm:$0xff] }
  0xd5   : > { %v790_v32 = vpop.f32.mrf.mxu2 }
  0xd6   : > { %870 = vmatpush.bf16.xpose.msrb.mxu3 %v856_v37  ;;  %v791_v4 = vadd.f32 %v1681_v49, %v790_v32 }
  0xdd   : > { %v793_v37 = vpop.f32.mrf.mxu2 }
  0xde   : > { %871 = vmatpush.bf16.xpose.msrb.mxu3 %v853_v42  ;;  %v794_v61 = vadd.f32 %v1681_v49, %v793_v37 }
  0xe5   : > { %1566 = vmatmul.msk.bf16.vlgmr.msrb.gmra.mxu3 %vm575_vm0, %v1599_v46  ;;  %v795_v42 = vpop.f32.mrf.mxu2 }
  0xed   : > { %v798_v46 = vpop.f32.mrf.mxu2 }
  0xf5   : > { %1567 = vmatmul.msk.bf16.gmra.mxu3 %vm575_vm0, %v1600_v50  ;;  %v800_v47 = vpop.f32.mrf.mxu2 }
  0xfd   : > { %v803_v48 = vpop.f32.mrf.mxu2 }
  0xfe   : > { %v804_v50 = vadd.f32 %v1681_v49, %v803_v48 }
 0x105   : > { %1568 = vmatmul.msk.bf16.gmra.mxu3 %vm575_vm0, %v1601_v51  ;;  %v805_v51 = vpop.f32.mrf.mxu2 }
 0x106   : > { %v806_v59 = vadd.f32 %v1681_v49, %v805_v51 }
 0x115   : > { %1569 = vmatmul.msk.bf16.gmra.mxu3 %vm575_vm0, %v1602_v52  ;;  %v799_v52 = vadd.f32 %v1681_v49, %v798_v46 }
 0x168   : > { %v2065_v53 = vpop.f32.mrf.mxu3 }
 0x169   : > { %v902_v54 = vsel %vm901_vm2, %v2065_v53, -inf }
 0x16a   : > { %903 = vmax.xlane.f32.xlu0 %v902_v54  ;;  %v801_v54 = vadd.f32 %v1681_v49, %v800_v47 }
 0x170   : > { %v2069_v55 = vpop.f32.mrf.mxu3 }
 0x171   : > { %v905_v60 = vsel %vm901_vm2, %v2069_v55, -inf }
 0x172   : > { %906 = vmax.xlane.f32.xlu0 %v905_v60  ;;  %v811_v60 = vpack.c.bf16 %v806_v59, %v804_v50 }
 0x174   : > { %1155 = vmatpush.bf16.msra.mxu0 %v811_v60 }
 0x178   : > { %v2079_v62 = vpop.f32.mrf.mxu3 }
 0x179   : > { %v908_v63 = vsel %vm901_vm2, %v2079_v62, -inf }
 0x17a   : > { %909 = vmax.xlane.f32.xlu1 %v908_v63  ;;  %v796_v63 = vadd.f32 %v1681_v49, %v795_v42 }
 0x180   : > { %v2085_v0 = vpop.f32.mrf.mxu3 }
 0x181   : > { %v911_v1 = vsel %vm901_vm2, %v2085_v0, -inf }
 0x182   : > { %912 = vmax.xlane.f32.xlu1 %v911_v1  ;;  %v810_v1 = vpack.c.bf16 %v801_v54, %v799_v52 }
 0x184   : > { %1156 = vmatpush.bf16.msra.mxu0 %v810_v1 }
 0x188   : > { %v2089_v2 = vpop.f32.mrf.mxu3 }
 0x189   : > { %v914_v3 = vsel %vm901_vm2, %v2089_v2, -inf }
 0x18a   : > { %915 = vmax.xlane.f32.xlu2 %v914_v3  ;;  %v789_v3 = vadd.f32 %v1681_v49, %v788_v27 }
 0x190   : > { %v2101_v58 = vpop.f32.mrf.mxu3 }
 0x191   : > { %v917_v57 = vsel %vm901_vm2, %v2101_v58, -inf }
 0x192   : > { %918 = vmax.xlane.f32.xlu2 %v917_v57  ;;  %v809_v57 = vpack.c.bf16 %v796_v63, %v794_v61 }
 0x194   : > { %1157 = vmatpush.bf16.msra.mxu0 %v809_v57 }
 0x198   : > { %v2107_v5 = vpop.f32.mrf.mxu3 }
 0x199   : > { %v920_v6 = vsel %vm901_vm2, %v2107_v5, -inf }
 0x19a   : > { %921 = vmax.xlane.f32.xlu2 %v920_v6  ;;  %v808_v6 = vpack.c.bf16 %v791_v4, %v789_v3 }
 0x19c   : > { %1158 = vmatpush.bf16.msra.mxu0 %v808_v6 }
 0x1a0   : > { %v2113_v7 = vpop.f32.mrf.mxu3 }
 0x1a1   : > { %v923_v8 = vsel %vm901_vm2, %v2113_v7, -inf }
 0x1a2   : > { %924 = vmax.xlane.f32.xlu2 %v923_v8 }
 0x1dd   : > { %v904_v56 = vpop.xlane.xlu0 %903 }
 0x1de   : > { %v2138_v11 = vmax.f32 %v2135_v23, %v904_v56 }
 0x1e0   : > { %v934_v12 = vsub.f32 %v2135_v23, %v2138_v11  ;;  %1196 = vst.msk [vmem:[#allocation3] sm:$0xff] %vm634_vm3, %v2138_v11  ;;  %960 = vperm.xlu0 %1674, %v2138_v11  }
 0x1e5   : > { %v907_v14 = vpop.xlane.xlu0 %906 }
 0x1e6   : > { %v2148_v15 = vmax.f32 %v2145_v13, %v907_v14 }
 0x1e8   : > { %v935_v16 = vsub.f32 %v2145_v13, %v2148_v15  ;;  %1197 = vst.msk [vmem:[#allocation3 + $0x8] sm:$0xff] %vm634_vm3, %v2148_v15  ;;  %965 = vperm.xlu1 %1675, %v2148_v15  }
 0x1ed   : > { %v910_v18 = vpop.xlane.xlu1 %909 }
 0x1ee   : > { %v2158_v19 = vmax.f32 %v2155_v17, %v910_v18 }
 0x1f0   : > { %v936_v20 = vsub.f32 %v2155_v17, %v2158_v19  ;;  %1198 = vst.msk [vmem:[#allocation3 + $0x10] sm:$0xff] %vm634_vm3, %v2158_v19  ;;  %970 = vperm.xlu2 %1676, %v2158_v19   ;;  %v1024_v17 = vld [vmem:[#allocation4 + $0x10] sm:$0xff] }
 0x1f2   : > { %v946_v6 = vmul.f32 1.442695, %v936_v20 }
 0x1f5   : > { %v913_v22 = vpop.xlane.xlu1 %912 }
 0x1f6   : > { %v2168_v24 = vmax.f32 %v2165_v21, %v913_v22 }
 0x1f8   : > { %v937_v25 = vsub.f32 %v2165_v21, %v2168_v24  ;;  %1199 = vst.msk [vmem:[#allocation3 + $0x18] sm:$0xff] %vm634_vm3, %v2168_v24  ;;  %975 = vperm.xlu1 %1675, %v2168_v24  }
 0x1fd   : > { %v916_v28 = vpop.xlane.xlu2 %915 }
 0x1fe   : > { %v2178_v29 = vmax.f32 %v2175_v26, %v916_v28 }
 0x200   : > { %v938_v30 = vsub.f32 %v2175_v26, %v2178_v29  ;;  %1200 = vst.msk [vmem:[#allocation3 + $0x20] sm:$0xff] %vm634_vm3, %v2178_v29  ;;  %980 = vperm.xlu1 %1675, %v2178_v29  }
 0x205   : > { %v919_v33 = vpop.xlane.xlu2 %918 }
 0x206   : > { %v2188_v34 = vmax.f32 %v2185_v31, %v919_v33 }
 0x208   : > { %v939_v35 = vsub.f32 %v2185_v31, %v2188_v34  ;;  %1201 = vst.msk [vmem:[#allocation3 + $0x28] sm:$0xff] %vm634_vm3, %v2188_v34  ;;  %985 = vperm.xlu0 %1674, %v2188_v34  }
 0x20a   : > { %v952_v26 = vmul.f32 1.442695, %v939_v35 }
 0x20d   : > { %v922_v38 = vpop.xlane.xlu2 %921 }
 0x20e   : > { %v2198_v39 = vmax.f32 %v2195_v36, %v922_v38 }
 0x210   : > { %v940_v40 = vsub.f32 %v2195_v36, %v2198_v39  ;;  %1202 = vst.msk [vmem:[#allocation3 + $0x30] sm:$0xff] %vm634_vm3, %v2198_v39  ;;  %990 = vperm.xlu2 %1676, %v2198_v39  }
 0x215   : > { %v925_v43 = vpop.xlane.xlu2 %924 }
 0x216   : > { %v2208_v44 = vmax.f32 %v2205_v41, %v925_v43 }
 0x218   : > { %v941_v45 = vsub.f32 %v2205_v41, %v2208_v44  ;;  %1203 = vst.msk [vmem:[#allocation3 + $0x38] sm:$0xff] %vm634_vm3, %v2208_v44  ;;  %995 = vperm.xlu1 %1675, %v2208_v44  }
 0x24a   : > { %v971_v8 = vpop.permute.xlu2 %970 }
 0x24b   : > { %v1000_v9 = vsub.f32 %v2079_v62, %v971_v8 }
 0x24d   : > { %v1010_v10 = vmul.f32 1.442695, %v1000_v9 }
 0x24f   : > { %1683 = vpow2.f32 %v1010_v10 }
 0x252   : > { %v961_v56 = vpop.permute.xlu0 %960 }
 0x253   : > { %v998_v14 = vsub.f32 %v2065_v53, %v961_v56  ;;  %v944_v53 = vmul.f32 1.442695, %v935_v16 }
 0x255   : > { %v1684_v18 = vpop.eup %1683  ;;  %v1006_v22 = vmul.f32 1.442695, %v998_v14 }
 0x256   : > { %v1044_v28 = vsel %vm901_vm2, %v1684_v18, 0.0 }
 0x257   : > { %1685 = vpow2.f32 %v1006_v22  ;;  %1045 = vadd.xlane.f32.xlu1 %v1044_v28 }
 0x25a   : > { %v966_v27 = vpop.permute.xlu1 %965 }
 0x25b   : > { %v999_v32 = vsub.f32 %v2069_v55, %v966_v27 }
 0x25d   : > { %v1686_v33 = vpop.eup %1685  ;;  %v1008_v37 = vmul.f32 1.442695, %v999_v32 }
 0x25e   : > { %v1038_v38 = vsel %vm901_vm2, %v1686_v33, 0.0 }
 0x25f   : > { %1687 = vpow2.f32 %v1008_v37  ;;  %1039 = vadd.xlane.f32.xlu0 %v1038_v38  ;;  %v950_v37 = vmul.f32 1.442695, %v938_v30 }
 0x260   : > { %1689 = vpow2.f32 %v944_v53  ;;  %v948_v53 = vmul.f32 1.442695, %v937_v25 }
 0x265   : > { %v1688_v62 = vpop.eup %1687 }
 0x266   : > { %v1135_v42 = vpack.c.bf16 %v1688_v62, %v1686_v33  ;;  %v1041_v43 = vsel %vm901_vm2, %v1688_v62, 0.0  ;;  %v1690_v48 = vpop.eup %1689  ;;  %v1023_v33 = vld [vmem:[#allocation4 + $0x8] sm:$0xff] }
 0x267   : > { %1042 = vadd.xlane.f32.xlu2 %v1041_v43  ;;  %v1031_v38 = vmul.f32 %v1690_v48, %v1023_v33 }
 0x268   : > { %1570 = vmatmul.msk.bf16.vlgmr.msra.gmra.mxu0 %vm901_vm2, %v1135_v42 }
 0x26a   : > { %v976_v46 = vpop.permute.xlu1 %975  ;;  %v991_v13 = vpop.permute.xlu2 %990 }
 0x26b   : > { %v1001_v55 = vsub.f32 %v2085_v0, %v976_v46  ;;  %v1004_v59 = vsub.f32 %v2107_v5, %v991_v13 }
 0x26d   : > { %v1012_v47 = vmul.f32 1.442695, %v1001_v55  ;;  %v1018_v61 = vmul.f32 1.442695, %v1004_v59  ;;  %v1025_v55 = vld [vmem:[#allocation4 + $0x18] sm:$0xff]  ;;  %v1027_v59 = vld [vmem:[#allocation4 + $0x28] sm:$0xff] }
 0x26f   : > { %1691 = vpow2.f32 %v1012_v47  ;;  %v954_v47 = vmul.f32 1.442695, %v940_v40 }
 0x272   : > { %v981_v49 = vpop.permute.xlu1 %980 }
 0x273   : > { %1094 = vperm.xlu0 %1674, %v1690_v48   ;;  %v1002_v51 = vsub.f32 %v2089_v2, %v981_v49  ;;  %v942_v2 = vmul.f32 1.442695, %v934_v12  ;;  %v1080_v48 = vld [vmem:[#allocation5 + $0x8] sm:$0xff] }
 0x275   : > { %v1692_v50 = vpop.eup %1691  ;;  %v1014_v15 = vmul.f32 1.442695, %v1002_v51 }
 0x276   : > { %v1047_v52 = vsel %vm901_vm2, %v1692_v50, 0.0  ;;  %v1136_v54 = vpack.c.bf16 %v1692_v50, %v1684_v18  ;;  %v1022_v18 = vld [vmem:[#allocation4] sm:$0xff] }
 0x277   : > { %1048 = vadd.xlane.f32.xlu2 %v1047_v52  ;;  %1693 = vpow2.f32 %v1014_v15  ;;  %v1079_v15 = vld [vmem:[#allocation5] sm:$0xff] }
 0x278   : > { %1571 = vmatmul.msk.bf16.gmra.mxu0 %vm901_vm2, %v1136_v54 }
 0x27a   : > { %v986_v16 = vpop.permute.xlu0 %985 }
 0x27b   : > { %v1003_v0 = vsub.f32 %v2101_v58, %v986_v16 }
 0x27d   : > { %v1016_v60 = vmul.f32 1.442695, %v1003_v0  ;;  %v1694_v63 = vpop.eup %1693 }
 0x27f   : > { %1695 = vpow2.f32 %v1016_v60  ;;  %v1081_v60 = vld [vmem:[#allocation5 + $0x10] sm:$0xff] }
 0x280   : > { %1697 = vpow2.f32 %v1018_v61 }
 0x281   : > { %1699 = vpow2.f32 %v942_v2 }
 0x285   : > { %v1696_v1 = vpop.eup %1695 }
 0x286   : > { %v1053_v3 = vsel %vm901_vm2, %v1696_v1, 0.0  ;;  %v1137_v4 = vpack.c.bf16 %v1696_v1, %v1694_v63  ;;  %v1698_v5 = vpop.eup %1697 }
 0x287   : > { %1054 = vadd.xlane.f32.xlu1 %v1053_v3  ;;  %v1700_v23 = vpop.eup %1699  ;;  %v1056_v11 = vsel %vm901_vm2, %v1698_v5, 0.0 }
 0x288   : > { %1572 = vmatmul.msk.bf16.gmra.mxu0 %vm901_vm2, %v1137_v4  ;;  %v1030_v22 = vmul.f32 %v1700_v23, %v1022_v18 }
 0x28a   : > { %v996_v58 = vpop.permute.xlu1 %995 }
 0x28b   : > { %v1005_v57 = vsub.f32 %v2113_v7, %v996_v58  ;;  %v1050_v7 = vsel %vm901_vm2, %v1694_v63, 0.0  ;;  %v956_v58 = vmul.f32 1.442695, %v941_v45 }
 0x28d   : > { %v1020_v8 = vmul.f32 1.442695, %v1005_v57 }
 0x28f   : > { %1701 = vpow2.f32 %v1020_v8  ;;  %1089 = vperm.xlu2 %1676, %v1700_v23   ;;  %1057 = vadd.xlane.f32.xlu1 %v1056_v11 }
 0x290   : > { %1703 = vpow2.f32 %v946_v6  ;;  %v1028_v6 = vld [vmem:[#allocation4 + $0x30] sm:$0xff] }
 0x295   : > { %v1702_v12 = vpop.eup %1701 }
 0x296   : > { %v1704_v9 = vpop.eup %1703  ;;  %v1059_v10 = vsel %vm901_vm2, %v1702_v12, 0.0  ;;  %v1138_v56 = vpack.c.bf16 %v1702_v12, %v1698_v5 }
 0x297   : > { %1099 = vperm.xlu2 %1676, %v1704_v9   ;;  %1060 = vadd.xlane.f32.xlu1 %v1059_v10  ;;  %v1032_v19 = vmul.f32 %v1704_v9, %v1024_v17  ;;  %v1029_v10 = vld [vmem:[#allocation4 + $0x38] sm:$0xff] }
 0x298   : > { %1573 = vmatmul.msk.bf16.gmra.mxu0 %vm901_vm2, %v1138_v56 }
 0x29d   : > { %1051 = vadd.xlane.f32.xlu0 %v1050_v7  ;;  %v1026_v7 = vld [vmem:[#allocation4 + $0x20] sm:$0xff] }
 0x2ca   : > { %v1046_v20 = vpop.xlane.xlu1 %1045 }
 0x2cb   : > { %v1064_v14 = vadd.f32 %v1046_v20, %v1032_v19 }
 0x2cd   : > { %1073 = vst.msk [vmem:[#allocation4 + $0x10] sm:$0xff] %vm634_vm3, %v1064_v14 }
 0x2d2   : > { %v1040_v28 = vpop.xlane.xlu0 %1039 }
 0x2d3   : > { %v1062_v27 = vadd.f32 %v1040_v28, %v1030_v22 }
 0x2d4   : > { %v1217_v32 = vld [vmem:[#allocation4 + $0x10] sm:$0xff] }
 0x2d5   : > { %1071 = vst.msk [vmem:[#allocation4] sm:$0xff] %vm634_vm3, %v1062_v27  ;;  %1705 = vrcp.f32 %v1217_v32 }
 0x2d6   : > { %1707 = vpow2.f32 %v950_v37 }
 0x2da   : > { %v1043_v62 = vpop.xlane.xlu2 %1042 }
 0x2db   : > { %v1706_v42 = vpop.eup %1705  ;;  %v1063_v43 = vadd.f32 %v1043_v62, %v1031_v38  ;;  %v1604_v38 = vld [vmem:[%s2370_s7 + $0x8] sm:$0xff]  ;;  %v1083_v62 = vld [vmem:[#allocation5 + $0x20] sm:$0xff] }
 0x2dc   : > { %1243 = vperm.xlu2 %1676, %v1706_v42   ;;  %v1215_v46 = vld [vmem:[#allocation4] sm:$0xff]  ;;  %v2259_v29 = vpop.eup %1707  ;;  %1321 = vmatpush.bf16.msra.mxu1 %v1604_v38 }
 0x2dd   : > { %1072 = vst.msk [vmem:[#allocation4 + $0x8] sm:$0xff] %vm634_vm3, %v1063_v43  ;;  %1709 = vrcp.f32 %v1215_v46  ;;  %v1034_v19 = vmul.f32 %v2259_v29, %v1026_v7 }
 0x2de   : > { %1711 = vpow2.f32 %v948_v53  ;;  %v1603_v53 = vld [vmem:[%s2370_s7] sm:$0xff] }
 0x2df   : > { %1713 = vpow2.f32 %v952_v26 }
 0x2e0   : > { %1322 = vmatpush.bf16.msra.mxu1 %v1603_v53 }
 0x2e3   : > { %v1710_v30 = vpop.eup %1709 }
 0x2e4   : > { %1109 = vperm.xlu2 %1676, %v2259_v29   ;;  %1233 = vperm.xlu1 %1675, %v1710_v30   ;;  %v1216_v21 = vld [vmem:[#allocation4 + $0x8] sm:$0xff]  ;;  %v1712_v25 = vpop.eup %1711 }
 0x2e5   : > { %v1160_v24 = vpop.f32.mrf.mxu0  ;;  %1715 = vrcp.f32 %v1216_v21  ;;  %v1095_v49 = vpop.permute.xlu0 %1094  ;;  %v1033_v31 = vmul.f32 %v1712_v25, %v1025_v55  ;;  %v1084_v30 = vld [vmem:[#allocation5 + $0x28] sm:$0xff] }
 0x2e6   : > { %v1714_v34 = vpop.eup %1713  ;;  %v1128_v52 = vmul.f32 %v1095_v49, %v1080_v48  ;;  %1717 = vpow2.f32 %v954_v47 }
 0x2e7   : > { %v1035_v61 = vmul.f32 %v1714_v34, %v1027_v59 }
 0x2ea   : > { %v1049_v35 = vpop.xlane.xlu2 %1048 }
 0x2eb   : > { %v1716_v50 = vpop.eup %1715  ;;  %v1065_v51 = vadd.f32 %v1049_v35, %v1033_v31 }
 0x2ec   : > { %1114 = vperm.xlu1 %1675, %v1714_v34   ;;  %1238 = vperm.xlu0 %1674, %v1716_v50   ;;  %v1718_v39 = vpop.eup %1717  ;;  %v1085_v50 = vld [vmem:[#allocation5 + $0x30] sm:$0xff] }
 0x2ed   : > { %1074 = vst.msk [vmem:[#allocation4 + $0x18] sm:$0xff] %vm634_vm3, %v1065_v51  ;;  %v1162_v54 = vpop.f32.mrf.mxu0  ;;  %v1036_v8 = vmul.f32 %v1718_v39, %v1028_v6  ;;  %v1082_v51 = vld [vmem:[#allocation5 + $0x18] sm:$0xff] }
 0x2ee   : > { %v1181_v13 = vadd.f32 %v1162_v54, %v1128_v52  ;;  %v1086_v6 = vld [vmem:[#allocation5 + $0x38] sm:$0xff] }
 0x2f0   : > { %1189 = vst.msk [vmem:[#allocation5 + $0x8] sm:$0xff] %vm575_vm0, %v1181_v13 }
 0x2f2   : > { %v1090_v36 = vpop.permute.xlu2 %1089 }
 0x2f3   : > { %v1127_v40 = vmul.f32 %v1090_v36, %v1079_v15 }
 0x2f4   : > { %1119 = vperm.xlu1 %1675, %v1718_v39   ;;  %1104 = vperm.xlu0 %1674, %v1712_v25   ;;  %v1218_v16 = vld [vmem:[#allocation4 + $0x18] sm:$0xff] }
 0x2f5   : > { %v1180_v0 = vadd.f32 %v1160_v24, %v1127_v40  ;;  %1719 = vrcp.f32 %v1218_v16  ;;  %v1165_v5 = vpop.f32.mrf.mxu0 }
 0x2f6   : > { %1721 = vpow2.f32 %v956_v58 }
 0x2f7   : > { %1188 = vst.msk [vmem:[#allocation5] sm:$0xff] %vm575_vm0, %v1180_v0  ;;  %v1208_v55 = vld [vmem:[#allocation5 + $0x8] sm:$0xff] }
 0x2fa   : > { %v1055_v63 = vpop.xlane.xlu1 %1054  ;;  %v1100_v2 = vpop.permute.xlu2 %1099 }
 0x2fb   : > { %v1720_v1 = vpop.eup %1719  ;;  %v1067_v3 = vadd.f32 %v1055_v63, %v1035_v61  ;;  %v1129_v4 = vmul.f32 %v1100_v2, %v1081_v60 }
 0x2fc   : > { %1248 = vperm.xlu0 %1674, %v1720_v1   ;;  %v1722_v9 = vpop.eup %1721 }
 0x2fd   : > { %1076 = vst.msk [vmem:[#allocation4 + $0x28] sm:$0xff] %vm634_vm3, %v1067_v3  ;;  %v1182_v57 = vadd.f32 %v1165_v5, %v1129_v4  ;;  %v1037_v41 = vmul.f32 %v1722_v9, %v1029_v10  ;;  %v1167_v33 = vpop.f32.mrf.mxu0 }
 0x2fe   : > { %v1207_v24 = vld [vmem:[#allocation5] sm:$0xff] }
 0x2ff   : > { %1190 = vst.msk [vmem:[#allocation5 + $0x10] sm:$0xff] %vm575_vm0, %v1182_v57 }
 0x302   : > { %v1058_v23 = vpop.xlane.xlu1 %1057 }
 0x303   : > { %v1068_v11 = vadd.f32 %v1058_v23, %v1036_v8 }
 0x304   : > { %v1220_v12 = vld [vmem:[#allocation4 + $0x28] sm:$0xff] }
 0x305   : > { %1077 = vst.msk [vmem:[#allocation4 + $0x30] sm:$0xff] %vm634_vm3, %v1068_v11  ;;  %1723 = vrcp.f32 %v1220_v12  ;;  %v1170_v46 = vpop.f32.mrf.mxu0 }
 0x306   : > { %v1209_v16 = vld [vmem:[#allocation5 + $0x10] sm:$0xff] }
 0x30a   : > { %v1061_v44 = vpop.xlane.xlu1 %1060 }
 0x30b   : > { %v1724_v45 = vpop.eup %1723  ;;  %v1069_v56 = vadd.f32 %v1061_v44, %v1037_v41 }
 0x30c   : > { %1258 = vperm.xlu2 %1676, %v1724_v45   ;;  %v1221_v17 = vld [vmem:[#allocation4 + $0x30] sm:$0xff] }
 0x30d   : > { %1078 = vst.msk [vmem:[#allocation4 + $0x38] sm:$0xff] %vm634_vm3, %v1069_v56  ;;  %1725 = vrcp.f32 %v1221_v17  ;;  %v1172_v21 = vpop.f32.mrf.mxu0  ;;  %v1682_v17 = vld [vmem:[%s2374_s11] ss:$0 sm:$0xff] }
 0x310   : > { %v1052_v20 = vpop.xlane.xlu0 %1051 }
 0x311   : > { %v1066_v14 = vadd.f32 %v1052_v20, %v1034_v19 }
 0x313   : > { %v1726_v18 = vpop.eup %1725  ;;  %1075 = vst.msk [vmem:[#allocation4 + $0x20] sm:$0xff] %vm634_vm3, %v1066_v14  ;;  %v1731_v14 = vld [vmem:[%s1964_s5] sm:$0xff] }
 0x314   : > { %1263 = vperm.xlu2 %1676, %v1726_v18   ;;  %v1222_v22 = vld [vmem:[#allocation4 + $0x38] sm:$0xff] }
 0x315   : > { %1727 = vrcp.f32 %v1222_v22  ;;  %v1175_v36 = vpop.f32.mrf.mxu0 }
 0x31a   : > { %v1219_v28 = vld [vmem:[#allocation4 + $0x20] sm:$0xff] }
 0x31b   : > { %v1728_v27 = vpop.eup %1727  ;;  %1729 = vrcp.f32 %v1219_v28  ;;  %v1345_v28 = vld [vmem:[%s1964_s5 + $0x8] sm:$0xff] }
 0x31c   : > { %1268 = vperm.xlu1 %1675, %v1728_v27  }
 0x31d   : > { %v1177_v11 = vpop.f32.mrf.mxu0 }
 0x321   : > { %v1730_v32 = vpop.eup %1729 }
 0x322   : > { %1253 = vperm.xlu0 %1674, %v1730_v32  }
 0x32a   : > { %1124 = vperm.xlu0 %1674, %v1722_v9  }
 0x336   : > { %v1244_v37 = vpop.permute.xlu2 %1243 }
 0x337   : > { %v1273_v60 = vmul.f32 %v1244_v37, %v1209_v16  ;;  %v1346_v37 = vld [vmem:[%s1964_s5 + $0x10] sm:$0xff] }
 0x33e   : > { %v1110_v42 = vpop.permute.xlu2 %1109 }
 0x33f   : > { %v1131_v43 = vmul.f32 %v1110_v42, %v1083_v62 }
 0x341   : > { %v1184_v26 = vadd.f32 %v1170_v46, %v1131_v43  ;;  %v1347_v43 = vld [vmem:[%s1964_s5 + $0x18] sm:$0xff] }
 0x343   : > { %1192 = vst.msk [vmem:[#allocation5 + $0x20] sm:$0xff] %vm575_vm0, %v1184_v26 }
 0x34a   : > { %v1211_v4 = vld [vmem:[#allocation5 + $0x20] sm:$0xff] }
 0x356   : > { %v1234_v29 = vpop.permute.xlu1 %1233 }
 0x357   : > { %v1271_v48 = vmul.f32 %v1234_v29, %v1207_v24 }
 0x35e   : > { %v1115_v25 = vpop.permute.xlu1 %1114  ;;  %v1239_v47 = vpop.permute.xlu0 %1238 }
 0x35f   : > { %v1132_v49 = vmul.f32 %v1115_v25, %v1084_v30  ;;  %v1272_v31 = vmul.f32 %v1239_v47, %v1208_v55  ;;  %v1732_v30 = vld [vmem:[%s1964_s5 + $0x20] sm:$0xff]  ;;  %v1733_v55 = vld [vmem:[%s1964_s5 + $0x28] sm:$0xff] }
 0x361   : > { %v1185_v34 = vadd.f32 %v1172_v21, %v1132_v49  ;;  %v1279_v35 = vpack.c.bf16 %v1272_v31, %v1271_v48  ;;  %v1734_v31 = vld [vmem:[%s1964_s5 + $0x30] sm:$0xff] }
 0x363   : > { %1193 = vst.msk [vmem:[#allocation5 + $0x28] sm:$0xff] %vm575_vm0, %v1185_v34  ;;  %1582 = vmatmul.msk.bf16.vlgmr.msra.gmra.mxu1 %vm575_vm0, %v1279_v35 }
 0x366   : > { %v1120_v52 = vpop.permute.xlu1 %1119  ;;  %v1105_v54 = vpop.permute.xlu0 %1104 }
 0x367   : > { %v1133_v13 = vmul.f32 %v1120_v52, %v1085_v50  ;;  %v1130_v15 = vmul.f32 %v1105_v54, %v1082_v51  ;;  %v1259_v1 = vpop.permute.xlu2 %1258  ;;  %v1735_v51 = vld [vmem:[%s1964_s5 + $0x38] sm:$0xff] }
 0x369   : > { %v1186_v39 = vadd.f32 %v1175_v36, %v1133_v13  ;;  %v1183_v40 = vadd.f32 %v1167_v33, %v1130_v15 }
 0x36a   : > { %v1212_v2 = vld [vmem:[#allocation5 + $0x28] sm:$0xff] }
 0x36b   : > { %1194 = vst.msk [vmem:[#allocation5 + $0x30] sm:$0xff] %vm575_vm0, %v1186_v39  ;;  %v1276_v58 = vmul.f32 %v1259_v1, %v1212_v2 }
 0x36c   : > { %1191 = vst.msk [vmem:[#allocation5 + $0x18] sm:$0xff] %vm575_vm0, %v1183_v40 }
 0x36e   : > { %v1249_v59 = vpop.permute.xlu0 %1248 }
 0x36f   : > { %v1264_v10 = vpop.permute.xlu2 %1263 }
 0x372   : > { %v1213_v9 = vld [vmem:[#allocation5 + $0x30] sm:$0xff] }
 0x373   : > { %v1210_v0 = vld [vmem:[#allocation5 + $0x18] sm:$0xff]  ;;  %v1277_v45 = vmul.f32 %v1264_v10, %v1213_v9 }
 0x374   : > { %v1274_v61 = vmul.f32 %v1249_v59, %v1210_v0 }
 0x376   : > { %v1280_v63 = vpack.c.bf16 %v1274_v61, %v1273_v60 }
 0x378   : > { %1583 = vmatmul.msk.bf16.gmra.mxu1 %vm575_vm0, %v1280_v63 }
 0x38e   : > { %v1269_v41 = vpop.permute.xlu1 %1268 }
 0x394   : > { %v1254_v3 = vpop.permute.xlu0 %1253 }
 0x395   : > { %v1275_v5 = vmul.f32 %v1254_v3, %v1211_v4 }
 0x397   : > { %v1281_v57 = vpack.c.bf16 %v1276_v58, %v1275_v5 }
 0x399   : > { %1584 = vmatmul.msk.bf16.gmra.mxu1 %vm575_vm0, %v1281_v57 }
 0x39c   : > { %v1125_v8 = vpop.permute.xlu0 %1124 }
 0x39d   : > { %v1134_v23 = vmul.f32 %v1125_v8, %v1086_v6 }
 0x39f   : > { %v1187_v12 = vadd.f32 %v1177_v11, %v1134_v23 }
 0x3a1   : > { %1195 = vst.msk [vmem:[#allocation5 + $0x38] sm:$0xff] %vm575_vm0, %v1187_v12 }
 0x3a8   : > { %v1214_v44 = vld [vmem:[#allocation5 + $0x38] sm:$0xff] }
 0x3a9   : > { %v1278_v56 = vmul.f32 %v1269_v41, %v1214_v44 }
 0x3ab   : > { %v1282_v7 = vpack.c.bf16 %v1278_v56, %v1277_v45 }
 0x3ad   : > { %1585 = vmatmul.msk.bf16.gmra.mxu1 %vm575_vm0, %v1282_v7 }
 0x3e0   : > { %v1324_v19 = vpop.f32.mrf.mxu1 }
 0x3e1   : > { %v1325_v20 = vadd.f32 %v1682_v17, %v1324_v19 }
 0x3e3   : > { %v1352_v18 = vadd.f32 %v1731_v14, %v1325_v20 }
 0x3e5   : > { %1360 = vst.msk [vmem:[%s2299_s17] sm:$0xff] %vm575_vm0, %v1352_v18 }
 0x3e8   : > { %v1326_v22 = vpop.f32.mrf.mxu1 }
 0x3e9   : > { %v1327_v27 = vadd.f32 %v1682_v17, %v1326_v22 }
 0x3eb   : > { %v1353_v32 = vadd.f32 %v1345_v28, %v1327_v27 }
 0x3ed   : > { %1361 = vst.msk [vmem:[%s2299_s17 + $0x8] sm:$0xff] %vm575_vm0, %v1353_v32 }
 0x3f5   : > { %v1329_v33 = vpop.f32.mrf.mxu1 }
 0x3f6   : > { %v1330_v38 = vadd.f32 %v1682_v17, %v1329_v33 }
 0x3f8   : > { %v1354_v62 = vadd.f32 %v1346_v37, %v1330_v38 }
 0x3fa   : > { %1362 = vst.msk [vmem:[%s2299_s17 + $0x10] sm:$0xff] %vm575_vm0, %v1354_v62 }
 0x3fd   : > { %v1331_v42 = vpop.f32.mrf.mxu1 }
 0x3fe   : > { %v1332_v53 = vadd.f32 %v1682_v17, %v1331_v42 }
 0x400   : > { %v1355_v46 = vadd.f32 %v1347_v43, %v1332_v53 }
 0x402   : > { %1363 = vst.msk [vmem:[%s2299_s17 + $0x18] sm:$0xff] %vm575_vm0, %v1355_v46 }
 0x416   : > { %v1334_v26 = vpop.f32.mrf.mxu1 }
 0x417   : > { %v1335_v29 = vadd.f32 %v1682_v17, %v1334_v26 }
 0x419   : > { %v1356_v21 = vadd.f32 %v1732_v30, %v1335_v29 }
 0x41b   : > { %1364 = vst.msk [vmem:[%s2299_s17 + $0x20] sm:$0xff] %vm575_vm0, %v1356_v21 }
 0x41e   : > { %v1336_v24 = vpop.f32.mrf.mxu1 }
 0x41f   : > { %v1337_v25 = vadd.f32 %v1682_v17, %v1336_v24 }
 0x421   : > { %v1357_v47 = vadd.f32 %v1733_v55, %v1337_v25 }
 0x423   : > { %1365 = vst.msk [vmem:[%s2299_s17 + $0x28] sm:$0xff] %vm575_vm0, %v1357_v47 }
 0x42a   : > { %v1339_v48 = vpop.f32.mrf.mxu1 }
 0x42b   : > { %v1340_v49 = vadd.f32 %v1682_v17, %v1339_v48 }
 0x42d   : > { %v1358_v34 = vadd.f32 %v1734_v31, %v1340_v49 }
 0x42f   : > { %1366 = vst.msk [vmem:[%s2299_s17 + $0x30] sm:$0xff] %vm575_vm0, %v1358_v34 }
 0x432   : > { %v1341_v35 = vpop.f32.mrf.mxu1 }
 0x433   : > { %v1342_v50 = vadd.f32 %v1682_v17, %v1341_v35 }
 0x435   : > { %v1359_v52 = vadd.f32 %v1735_v51, %v1342_v50 }
 0x437   : > { %1367 = vst.msk [vmem:[%s2299_s17 + $0x38] sm:$0xff] %vm575_vm0, %v1359_v52 }
 0x438   : > { %1763 = shalt.err (!%p1760_p5)
}
 0x439   : > { %s1819_s5 = smov 128   ;;  %s1820_s25 = smov 8  }
 0x43a   : > { %1614 = dma.vmem_to_hbm [thread:$0]  (%p1926_p4), %s1384_s28, 1024, %s1386_s29, %s1369_s24, %s1819_s5, %s1819_s5, %s1820_s25  }
 0x43b PF: > { %p1620_p6 = scmp.ge.s32.totalorder %s1814_s26, 2  ;;  %s1400_s20 = sand.u32 1, %s1794_s21  }
 0x43c   : > { %s1401_s27 = scalar_lea.sflag [#allocation7], %s1400_s20 }
 0x43d   : > { %p1617_p7 = pnand %p1620_p6, %p1933_p8 }
 0x43f   : > { %p1618_p9 = pneg %p1617_p7 }
 0x441   : > { %1789 = dma.done.wait (%p1618_p9), %s1401_s27, 1024  }
 0x442   : > { %1791 = vsyncadd (%p1618_p9), %s1401_s27, 4294966272  ;;  %s25_s26 = sadd.s32 1, %s1814_s26   ;;  %s2390_s14 = sld [smem:[#allocation9_spill]] }
 0x443   : > { %p22_p10 = scmp.ge.s32.totalorder %s25_s26, 4   ;;  %s2391_s23 = sld [smem:[#allocation13_spill]] }
 0x444   : > { %s2392_s24 = sld [smem:[#allocation10_spill]]  ;;  %s2394_s21 = smov %s1798_s22 }
 0x445   : > { %s2393_s25 = sld [smem:[#allocation11_spill]]  ;;  %24 = sbr.rel (!%p22_p10) target bundleno = 6 (0x6), region = 120 }
 0x448   : > { %s2395_s22 = smov %s2390_s14 }
 0x44a   :  { %1407 = vsyncpa [#allocation7], 1 }
 0x44b   :  { %1409 = vsyncpa [#allocation7 + $0x1], 1 }

</bundles_post_ra>
